<compile_context>
chip_gen: v6e
topology: v6e:2x2x1
jax: 0.10.0
libtpu: 0.0.40
codegen_flags: <defaults>
</compile_context>

<pallas_src>
import functools

import jax
import jax.numpy as jnp
from jax.experimental import pallas as pl
from jax.experimental.pallas import tpu as pltpu


def _prior_kernel(pw_ref, phi_ref, w1_ref, b1_ref, w2_ref, b2_ref, w3_ref,
                  b3_ref, w4_ref, b4_ref, out_ref, *, use_prior):
    """One batch tile.  Batch lives on the lane axis: phi_ref is [D, tb]."""
    phi = phi_ref[...]                                     # [D, tb] f32

    def silu(x):
        # exp and the approximate reciprocal both live on the EUP slot.
        return x * pl.reciprocal(1.0 + jnp.exp(-x), approx=True)

    # MXU matmuls in bf16 with f32 accumulation; elementwise math stays f32.
    h = jnp.dot(w1_ref[...], phi.astype(jnp.bfloat16),
                preferred_element_type=jnp.float32) + b1_ref[...]      # [H, tb]
    h = silu(h)
    h = jnp.dot(w2_ref[...], h.astype(jnp.bfloat16),
                preferred_element_type=jnp.float32) + b2_ref[...]
    h = silu(h)
    h = jnp.dot(w3_ref[...], h.astype(jnp.bfloat16),
                preferred_element_type=jnp.float32) + b3_ref[...]
    h = silu(h)

    # Final 256 -> 1 layer as broadcast-multiply + sublane reduction (XLU slot)
    # instead of a 1-wide MXU matmul.  Result is lane-dense: [1, tb].
    e = jnp.sum(h * w4_ref[...], axis=0, keepdims=True) + b4_ref[...]

    if use_prior:
        # base_e = ||phi||_2 / latent_dim, computed from the original f32 phi.
        base_e = jnp.sqrt(jnp.sum(phi * phi, axis=0, keepdims=True)) / phi.shape[0]
        e = e + base_e * pw_ref[0]

    out_ref[...] = e.astype(out_ref.dtype)


def prior_forward(phi, params, prior_weight, *, use_prior=True, block_b=256):
    """phi: [B, latent_dim] f32; params: (w1,b1,...,w4,b4), w:[in,out], b:[1,out].

    Returns e: [B, 1] f32.
    """
    B, D = phi.shape
    w1, b1, w2, b2, w3, b3, w4, b4 = params
    H = w1.shape[1]

    # ---- batch tile selection ------------------------------------------------
    if B <= block_b:
        tb = max(8, ((B + 7) // 8) * 8)          # single grid step, full-extent block
    else:
        assert block_b % 128 == 0, "batch tile must be a multiple of 128 when tiling"
        tb = block_b
    Bp = ((B + tb - 1) // tb) * tb
    grid = (Bp // tb,)

    # ---- one-time layout prep (cheap wrapper-side XLA ops) ---------------------
    # Batch goes on the lane axis inside the kernel: transpose phi and weights;
    # MXU operands are cast to bf16 (f32 accumulation happens in-kernel).
    phi_t = phi.astype(jnp.float32).T                               # [D, B]
    if Bp != B:
        phi_t = jnp.pad(phi_t, ((0, 0), (0, Bp - B)))
    w1t = w1.T.astype(jnp.bfloat16)                                 # [H, D]
    w2t = w2.T.astype(jnp.bfloat16)                                 # [H, H]
    w3t = w3.T.astype(jnp.bfloat16)                                 # [H, H]
    w4c = w4.astype(jnp.float32)                                    # [H, 1] (VPU/XLU path)
    b1c = b1.T.astype(jnp.float32)                                  # [H, 1]
    b2c = b2.T.astype(jnp.float32)
    b3c = b3.T.astype(jnp.float32)
    b4c = b4.astype(jnp.float32)                                    # [1, 1]
    pw = jnp.asarray(prior_weight, jnp.float32).reshape((1,))       # SMEM scalar

    kernel = functools.partial(_prior_kernel, use_prior=bool(use_prior))
    full = lambda shape: pl.BlockSpec(shape, lambda i: (0,) * len(shape))

    out_row = pl.pallas_call(
        kernel,
        out_shape=jax.ShapeDtypeStruct((1, Bp), jnp.float32),
        grid_spec=pltpu.PrefetchScalarGridSpec(
            num_scalar_prefetch=0,
            grid=grid,
            in_specs=[
                pl.BlockSpec(memory_space=pltpu.MemorySpace.SMEM),  # prior_weight
                pl.BlockSpec((D, tb), lambda i: (0, i)),            # phi^T batch tile
                full((H, D)), full((H, 1)),                         # layer 1
                full((H, H)), full((H, 1)),                         # layer 2
                full((H, H)), full((H, 1)),                         # layer 3
                full((H, 1)), full((1, 1)),                         # layer 4
            ],
            out_specs=pl.BlockSpec((1, tb), lambda i: (0, i)),      # lane-dense output
        ),
        compiler_params=pltpu.CompilerParams(
            dimension_semantics=("parallel",)),
    )(pw, phi_t, w1t, b1c, w2t, b2c, w3t, b3c, w4c, b4c)

    return out_row.T[:B]                                            # [B, 1]


def init_params(key, latent_dim, hidden=256):
    """Deterministic synthetic init (uniform, roughly fan-in scaled)."""
    ks = jax.random.split(key, 8)

    def lin(kw, kb, fan_in, fan_out):
        bound = 1.0 / jnp.sqrt(fan_in)
        w = jax.random.uniform(kw, (fan_in, fan_out), jnp.float32, -bound, bound)
        b = jax.random.uniform(kb, (1, fan_out), jnp.float32, -bound, bound)
        return w, b

    w1, b1 = lin(ks[0], ks[1], latent_dim, hidden)
    w2, b2 = lin(ks[2], ks[3], hidden, hidden)
    w3, b3 = lin(ks[4], ks[5], hidden, hidden)
    w4, b4 = lin(ks[6], ks[7], hidden, 1)
    return (w1, b1, w2, b2, w3, b3, w4, b4)


def prior_forward_ref(phi, params, *, prior_weight=1.0, use_prior=True):
    """Pure-JAX f32 reference for correctness checking."""
    w1, b1, w2, b2, w3, b3, w4, b4 = params
    silu = lambda x: x * jax.nn.sigmoid(x)
    h = silu(phi @ w1 + b1)
    h = silu(h @ w2 + b2)
    h = silu(h @ w3 + b3)
    e = h @ w4 + b4
    if use_prior:
        base_e = jnp.linalg.norm(phi, axis=-1, keepdims=True) / phi.shape[-1]
        e = e + base_e * prior_weight
    return e


if __name__ == "__main__":
    key = jax.random.PRNGKey(0)
    k_phi, k_params, k_phi2 = jax.random.split(key, 3)

    latent_dim = 32
    prior_weight = 0.1            # configs.loss.kl_weight
    use_prior = True              # not configs.model.deterministic_phi
    params = init_params(k_params, latent_dim)

    # Small case (single grid step), shapes consistent with the module.
    B = 8
    phi = jax.random.normal(k_phi, (B, latent_dim), jnp.float32)
    e = jax.block_until_ready(
        prior_forward(phi, params, prior_weight, use_prior=use_prior))
    e_ref = prior_forward_ref(phi, params, prior_weight=prior_weight,
                              use_prior=use_prior)
    assert e.shape == (B, 1)
    # bf16 MXU inputs + approx-reciprocal SiLU vs. f32 reference -> relaxed tol.
    assert jnp.allclose(e, e_ref, atol=1e-2, rtol=1e-2), \
        float(jnp.max(jnp.abs(e - e_ref)))

    # Tiled case: multi-step grid (exercises batch tiling, padding, and the
    # 'parallel' grid axis that splits across both TensorCores on v7x).
    B2 = 384
    phi2 = jax.random.normal(k_phi2, (B2, latent_dim), jnp.float32)
    e2 = jax.block_until_ready(
        prior_forward(phi2, params, prior_weight, use_prior=use_prior))
    e2_ref = prior_forward_ref(phi2, params, prior_weight=prior_weight,
                               use_prior=use_prior)
    assert e2.shape == (B2, 1)
    assert jnp.allclose(e2, e2_ref, atol=1e-2, rtol=1e-2), \
        float(jnp.max(jnp.abs(e2 - e2_ref)))

    print("KERNEL_OK")
</pallas_src>

<mosaic_0001>
module attributes {stable_mosaic.version = 11 : i64} {
  func.func @_prior_kernel(%arg0: i32, %arg1: memref<1xf32, #tpu.memory_space<smem>>, %arg2: memref<32x8xf32, #tpu.memory_space<vmem>>, %arg3: memref<256x32xbf16, #tpu.memory_space<vmem>>, %arg4: memref<256x1xf32, #tpu.memory_space<vmem>>, %arg5: memref<256x256xbf16, #tpu.memory_space<vmem>>, %arg6: memref<256x1xf32, #tpu.memory_space<vmem>>, %arg7: memref<256x256xbf16, #tpu.memory_space<vmem>>, %arg8: memref<256x1xf32, #tpu.memory_space<vmem>>, %arg9: memref<256x1xf32, #tpu.memory_space<vmem>>, %arg10: memref<1x1xf32, #tpu.memory_space<vmem>>, %arg11: memref<1x8xf32, #tpu.memory_space<vmem>>) attributes {dimension_semantics = [#tpu.dimension_semantics<parallel>], iteration_bounds = array<i64: 1>, scalar_prefetch = 0 : i64, scratch_operands = 0 : i64, tpu.core_type = #tpu.core_type<tc>, window_params = [{transform_indices = @transform_0, window_bounds = array<i64: 1>}, {transform_indices = @transform_1, window_bounds = array<i64: 32, 8>}, {pipeline_mode = #tpu.pipeline_mode<synchronous>, transform_indices = @transform_2, window_bounds = array<i64: 256, 32>}, {pipeline_mode = #tpu.pipeline_mode<synchronous>, transform_indices = @transform_3, window_bounds = array<i64: 256, 1>}, {pipeline_mode = #tpu.pipeline_mode<synchronous>, transform_indices = @transform_4, window_bounds = array<i64: 256, 256>}, {pipeline_mode = #tpu.pipeline_mode<synchronous>, transform_indices = @transform_5, window_bounds = array<i64: 256, 1>}, {pipeline_mode = #tpu.pipeline_mode<synchronous>, transform_indices = @transform_6, window_bounds = array<i64: 256, 256>}, {pipeline_mode = #tpu.pipeline_mode<synchronous>, transform_indices = @transform_7, window_bounds = array<i64: 256, 1>}, {pipeline_mode = #tpu.pipeline_mode<synchronous>, transform_indices = @transform_8, window_bounds = array<i64: 256, 1>}, {pipeline_mode = #tpu.pipeline_mode<synchronous>, transform_indices = @transform_9, window_bounds = array<i64: 1, 1>}, {transform_indices = @transform_10, window_bounds = array<i64: 1, 8>}]} {
    %c0 = arith.constant 0 : index
    %c0_0 = arith.constant 0 : index
    %0 = vector.load %arg2[%c0, %c0_0] : memref<32x8xf32, #tpu.memory_space<vmem>>, vector<32x8xf32>
    %c0_1 = arith.constant 0 : index
    %c0_2 = arith.constant 0 : index
    %1 = vector.load %arg3[%c0_1, %c0_2] : memref<256x32xbf16, #tpu.memory_space<vmem>>, vector<256x32xbf16>
    %2 = arith.truncf %0 : vector<32x8xf32> to vector<32x8xbf16>
    %cst = arith.constant dense<0.000000e+00> : vector<256x8xf32>
    %3 = tpu.matmul %1, %2, %cst {dimension_numbers = #tpu.dot_dimension_numbers<[1], [0], [0], [1], [0, 0, 1, 1], [], []>} : vector<256x32xbf16>, vector<32x8xbf16>, vector<256x8xf32> -> vector<256x8xf32>
    %c0_3 = arith.constant 0 : index
    %c0_4 = arith.constant 0 : index
    %4 = vector.load %arg4[%c0_3, %c0_4] : memref<256x1xf32, #tpu.memory_space<vmem>>, vector<256x1xf32>
    %5 = vector.broadcast %4 : vector<256x1xf32> to vector<256x8xf32>
    %6 = arith.addf %3, %5 : vector<256x8xf32>
    %cst_5 = arith.constant 0.000000e+00 : f32
    %7 = vector.broadcast %cst_5 : f32 to vector<256x8xf32>
    %8 = arith.subf %7, %6 : vector<256x8xf32>
    %9 = math.exp %8 : vector<256x8xf32>
    %cst_6 = arith.constant 1.000000e+00 : f32
    %10 = vector.broadcast %cst_6 : f32 to vector<256x8xf32>
    %11 = arith.addf %10, %9 : vector<256x8xf32>
    %12 = tpu.reciprocal %11 {approx = true} : vector<256x8xf32> -> vector<256x8xf32>
    %13 = arith.mulf %6, %12 : vector<256x8xf32>
    %c0_7 = arith.constant 0 : index
    %c0_8 = arith.constant 0 : index
    %14 = vector.load %arg5[%c0_7, %c0_8] : memref<256x256xbf16, #tpu.memory_space<vmem>>, vector<256x256xbf16>
    %15 = arith.truncf %13 : vector<256x8xf32> to vector<256x8xbf16>
    %cst_9 = arith.constant dense<0.000000e+00> : vector<256x8xf32>
    %16 = tpu.matmul %14, %15, %cst_9 {dimension_numbers = #tpu.dot_dimension_numbers<[1], [0], [0], [1], [0, 0, 1, 1], [], []>} : vector<256x256xbf16>, vector<256x8xbf16>, vector<256x8xf32> -> vector<256x8xf32>
    %c0_10 = arith.constant 0 : index
    %c0_11 = arith.constant 0 : index
    %17 = vector.load %arg6[%c0_10, %c0_11] : memref<256x1xf32, #tpu.memory_space<vmem>>, vector<256x1xf32>
    %18 = vector.broadcast %17 : vector<256x1xf32> to vector<256x8xf32>
    %19 = arith.addf %16, %18 : vector<256x8xf32>
    %cst_12 = arith.constant 0.000000e+00 : f32
    %20 = vector.broadcast %cst_12 : f32 to vector<256x8xf32>
    %21 = arith.subf %20, %19 : vector<256x8xf32>
    %22 = math.exp %21 : vector<256x8xf32>
    %cst_13 = arith.constant 1.000000e+00 : f32
    %23 = vector.broadcast %cst_13 : f32 to vector<256x8xf32>
    %24 = arith.addf %23, %22 : vector<256x8xf32>
    %25 = tpu.reciprocal %24 {approx = true} : vector<256x8xf32> -> vector<256x8xf32>
    %26 = arith.mulf %19, %25 : vector<256x8xf32>
    %c0_14 = arith.constant 0 : index
    %c0_15 = arith.constant 0 : index
    %27 = vector.load %arg7[%c0_14, %c0_15] : memref<256x256xbf16, #tpu.memory_space<vmem>>, vector<256x256xbf16>
    %28 = arith.truncf %26 : vector<256x8xf32> to vector<256x8xbf16>
    %cst_16 = arith.constant dense<0.000000e+00> : vector<256x8xf32>
    %29 = tpu.matmul %27, %28, %cst_16 {dimension_numbers = #tpu.dot_dimension_numbers<[1], [0], [0], [1], [0, 0, 1, 1], [], []>} : vector<256x256xbf16>, vector<256x8xbf16>, vector<256x8xf32> -> vector<256x8xf32>
    %c0_17 = arith.constant 0 : index
    %c0_18 = arith.constant 0 : index
    %30 = vector.load %arg8[%c0_17, %c0_18] : memref<256x1xf32, #tpu.memory_space<vmem>>, vector<256x1xf32>
    %31 = vector.broadcast %30 : vector<256x1xf32> to vector<256x8xf32>
    %32 = arith.addf %29, %31 : vector<256x8xf32>
    %cst_19 = arith.constant 0.000000e+00 : f32
    %33 = vector.broadcast %cst_19 : f32 to vector<256x8xf32>
    %34 = arith.subf %33, %32 : vector<256x8xf32>
    %35 = math.exp %34 : vector<256x8xf32>
    %cst_20 = arith.constant 1.000000e+00 : f32
    %36 = vector.broadcast %cst_20 : f32 to vector<256x8xf32>
    %37 = arith.addf %36, %35 : vector<256x8xf32>
    %38 = tpu.reciprocal %37 {approx = true} : vector<256x8xf32> -> vector<256x8xf32>
    %39 = arith.mulf %32, %38 : vector<256x8xf32>
    %c0_21 = arith.constant 0 : index
    %c0_22 = arith.constant 0 : index
    %40 = vector.load %arg9[%c0_21, %c0_22] : memref<256x1xf32, #tpu.memory_space<vmem>>, vector<256x1xf32>
    %41 = vector.broadcast %40 : vector<256x1xf32> to vector<256x8xf32>
    %42 = arith.mulf %39, %41 : vector<256x8xf32>
    %cst_23 = arith.constant dense<0.000000e+00> : vector<8xf32>
    %43 = vector.multi_reduction <add>, %42, %cst_23 [0] : vector<256x8xf32> to vector<8xf32>
    %44 = vector.shape_cast %43 : vector<8xf32> to vector<1x8xf32>
    %c0_24 = arith.constant 0 : index
    %c0_25 = arith.constant 0 : index
    %45 = vector.load %arg10[%c0_24, %c0_25] : memref<1x1xf32, #tpu.memory_space<vmem>>, vector<1x1xf32>
    %46 = vector.broadcast %45 : vector<1x1xf32> to vector<1x8xf32>
    %47 = arith.addf %44, %46 : vector<1x8xf32>
    %48 = arith.mulf %0, %0 : vector<32x8xf32>
    %cst_26 = arith.constant dense<0.000000e+00> : vector<8xf32>
    %49 = vector.multi_reduction <add>, %48, %cst_26 [0] : vector<32x8xf32> to vector<8xf32>
    %50 = vector.shape_cast %49 : vector<8xf32> to vector<1x8xf32>
    %51 = math.sqrt %50 : vector<1x8xf32>
    %cst_27 = arith.constant 3.200000e+01 : f32
    %52 = vector.broadcast %cst_27 : f32 to vector<1x8xf32>
    %53 = arith.divf %51, %52 : vector<1x8xf32>
    %c0_28 = arith.constant 0 : index
    %54 = memref.load %arg1[%c0_28] : memref<1xf32, #tpu.memory_space<smem>>
    %55 = vector.broadcast %54 : f32 to vector<1x8xf32>
    %56 = arith.mulf %53, %55 : vector<1x8xf32>
    %57 = arith.addf %47, %56 : vector<1x8xf32>
    %c0_29 = arith.constant 0 : index
    %c0_30 = arith.constant 0 : index
    %58 = vector.load %arg11[%c0_29, %c0_30] : memref<1x8xf32, #tpu.memory_space<vmem>>, vector<1x8xf32>
    tpu.vector_store %arg11[%c0_29, %c0_30], %57 {strides = array<i32>} : memref<1x8xf32, #tpu.memory_space<vmem>>, vector<1x8xf32>,
    return
  }
  func.func @transform_0(%arg0: i32) -> i32 {
    %c0_i32 = arith.constant 0 : i32
    %c0_i32_0 = arith.constant 0 : i32
    return %c0_i32 : i32
  }
  func.func @transform_1(%arg0: i32) -> (i32, i32) {
    %c0_i32 = arith.constant 0 : i32
    %c0_i32_0 = arith.constant 0 : i32
    return %c0_i32, %arg0 : i32, i32
  }
  func.func @transform_2(%arg0: i32) -> (i32, i32) {
    %c0_i32 = arith.constant 0 : i32
    %c0_i32_0 = arith.constant 0 : i32
    %c0_i32_1 = arith.constant 0 : i32
    return %c0_i32, %c0_i32_0 : i32, i32
  }
  func.func @transform_3(%arg0: i32) -> (i32, i32) {
    %c0_i32 = arith.constant 0 : i32
    %c0_i32_0 = arith.constant 0 : i32
    %c0_i32_1 = arith.constant 0 : i32
    return %c0_i32, %c0_i32_0 : i32, i32
  }
  func.func @transform_4(%arg0: i32) -> (i32, i32) {
    %c0_i32 = arith.constant 0 : i32
    %c0_i32_0 = arith.constant 0 : i32
    %c0_i32_1 = arith.constant 0 : i32
    return %c0_i32, %c0_i32_0 : i32, i32
  }
  func.func @transform_5(%arg0: i32) -> (i32, i32) {
    %c0_i32 = arith.constant 0 : i32
    %c0_i32_0 = arith.constant 0 : i32
    %c0_i32_1 = arith.constant 0 : i32
    return %c0_i32, %c0_i32_0 : i32, i32
  }
  func.func @transform_6(%arg0: i32) -> (i32, i32) {
    %c0_i32 = arith.constant 0 : i32
    %c0_i32_0 = arith.constant 0 : i32
    %c0_i32_1 = arith.constant 0 : i32
    return %c0_i32, %c0_i32_0 : i32, i32
  }
  func.func @transform_7(%arg0: i32) -> (i32, i32) {
    %c0_i32 = arith.constant 0 : i32
    %c0_i32_0 = arith.constant 0 : i32
    %c0_i32_1 = arith.constant 0 : i32
    return %c0_i32, %c0_i32_0 : i32, i32
  }
  func.func @transform_8(%arg0: i32) -> (i32, i32) {
    %c0_i32 = arith.constant 0 : i32
    %c0_i32_0 = arith.constant 0 : i32
    %c0_i32_1 = arith.constant 0 : i32
    return %c0_i32, %c0_i32_0 : i32, i32
  }
  func.func @transform_9(%arg0: i32) -> (i32, i32) {
    %c0_i32 = arith.constant 0 : i32
    %c0_i32_0 = arith.constant 0 : i32
    %c0_i32_1 = arith.constant 0 : i32
    return %c0_i32, %c0_i32_0 : i32, i32
  }
  func.func @transform_10(%arg0: i32) -> (i32, i32) {
    %c0_i32 = arith.constant 0 : i32
    %c0_i32_0 = arith.constant 0 : i32
    return %c0_i32, %arg0 : i32, i32
  }
}

</mosaic_0001>

<bundles_post_ra>
// kernel: tpu_custom_call.1
= control target key start
LH: loop header
LB: loop body
LE: loop exit
PB: predicated region body
PF: predicated region fallthrough
CT: control target
= control target key end

     0   :  { %s5124_s0 = inlined_call_operand.<no memory space> [shape: f32[1], index: 0, kind: input, shape index: {}]   ;;  %s5125_s1 = inlined_call_operand.vmem [shape: f32[32,8], index: 1, kind: input, shape index: {}]   ;;  %s5126_s2 = inlined_call_operand.vmem [shape: bf16[256,32], index: 2, kind: input, shape index: {}]   ;;  %s5127_s3 = inlined_call_operand.vmem [shape: f32[256,1], index: 3, kind: input, shape index: {}]   ;;  %s5128_s4 = inlined_call_operand.vmem [shape: bf16[256,256], index: 4, kind: input, shape index: {}]   ;;  %s5129_s5 = inlined_call_operand.vmem [shape: f32[256,1], index: 5, kind: input, shape index: {}]   ;;  %s5130_s6 = inlined_call_operand.vmem [shape: bf16[256,256], index: 6, kind: input, shape index: {}]   ;;  %s5131_s7 = inlined_call_operand.vmem [shape: f32[256,1], index: 7, kind: input, shape index: {}]   ;;  %s5132_s8 = inlined_call_operand.vmem [shape: f32[256,1], index: 8, kind: input, shape index: {}]   ;;  %s5133_s9 = inlined_call_operand.<no memory space> [shape: f32[1,1], index: 9, kind: input, shape index: {}]   ;;  %s5134_s10 = inlined_call_operand.hbm [shape: f32[1,8], index: 10, kind: output, shape index: {}]  }
   0x1   :  { %v16_v0 = vstv %s5133_s9 }
   0x2   :  { %17 = vst [vmem:[#allocation3] sm:$0x1] %v16_v0 }
   0x3   :  { %v108_v1 = vld [vmem:[%s5127_s3 + $0xf0] sm:$0xff]  ;;  %v3511_v4 = vmov 0   ;;  %v43_v5 = vld [vmem:[%s5125_s1 + $0x18] sm:$0xff]  ;;  %vm2482_vm0 = vcmask 64512   ;;  %v40_v9 = vld [vmem:[%s5125_s1] sm:$0xff]  ;;  %vm350_vm1 = vcmask 261120  }
   0x4   :  { %v92_v2 = vld [vmem:[%s5127_s3 + $0x70] sm:$0xff]  ;;  %2990 = vset.pattern.permute.xlu1 %v3511_v4  ;;  %2989 = vset.pattern.permute.xlu0 %v3511_v4  ;;  %v109_v8 = vld [vmem:[%s5127_s3 + $0xf8] sm:$0xff]  ;;  %v41_v10 = vld [vmem:[%s5125_s1 + $0x8] sm:$0xff]  ;;  %v2566_v11 = vmul.f32 %v43_v5, %v43_v5  ;;  %v2563_v14 = vmul.f32 %v40_v9, %v40_v9 }
   0x5   :  { %v42_v3 = vld [vmem:[%s5125_s1 + $0x10] sm:$0xff]  ;;  %262 = vperm.xlu0 %2989, %v108_v1   ;;  %182 = vperm.xlu1 %2990, %v92_v2   ;;  %v93_v12 = vld [vmem:[%s5127_s3 + $0x78] sm:$0xff]  ;;  %v76_v13 = vpack.c.bf16 %v41_v10, %v40_v9  ;;  %v2564_v15 = vmul.f32 %v41_v10, %v41_v10  ;;  %v2991_v16 = vld [vmem:[%s5126_s2] sm:$0xff]  }
   0x6   :  { %v2565_v6 = vmul.f32 %v42_v3, %v42_v3  ;;  %v77_v7 = vpack.c.bf16 %v43_v5, %v42_v3  ;;  %v2567_v18 = vsel %vm2482_vm0, %v2563_v14, 0.0  ;;  %v2992_v20 = vld [vmem:[%s5126_s2 + $0x40] sm:$0xff]   ;;  %v2572_v22 = vsel %vm2482_vm0, %v2566_v11, 0.0  ;;  %v107_v24 = vld [vmem:[%s5127_s3 + $0xe8] sm:$0xff]  ;;  %2951 = vmatprep.mubr.msk.bf16.mxu0 %vm350_vm1, %v2991_v16  ;;  %v2995_v29 = vld [vmem:[%s5126_s2 + $0x10] sm:$0xff]  }
   0x7   :  { %v2568_v19 = vsel %vm2482_vm0, %v2564_v15, 0.0  ;;  %v106_v23 = vld [vmem:[%s5127_s3 + $0xe0] sm:$0xff]  ;;  %2967 = vmatprep.mubr.msk.bf16.mxu1 %vm350_vm1, %v2992_v20  ;;  %v2993_v26 = vld [vmem:[%s5126_s2 + $0x8] sm:$0xff]   ;;  %v2996_v31 = vld [vmem:[%s5126_s2 + $0x50] sm:$0xff]  }
   0x8   :  { %2947 = vmatprep.subr.bf16.mxu0 %v77_v7  ;;  %2983 = vmatprep.subr.bf16.mxu1 %v77_v7  ;;  %v2570_v17 = vsel %vm2482_vm0, %v2565_v6, 0.0  ;;  %v2569_v21 = vadd.f32 %v2568_v19, %v2567_v18  ;;  %v2994_v27 = vld [vmem:[%s5126_s2 + $0x48] sm:$0xff]   ;;  %v90_v32 = vld [vmem:[%s5127_s3 + $0x60] sm:$0xff]  ;;  %v105_v33 = vld [vmem:[%s5127_s3 + $0xd8] sm:$0xff] }
   0x9   :  { %2948 = vmatpush3.bf16.msra.mxu0 %v77_v7  ;;  %2985 = vmatpush3.bf16.msra.mxu1 %v77_v7  ;;  %v91_v28 = vld [vmem:[%s5127_s3 + $0x68] sm:$0xff]  ;;  %v104_v34 = vld [vmem:[%s5127_s3 + $0xd0] sm:$0xff]  ;;  %v2997_v35 = vld [vmem:[%s5126_s2 + $0x18] sm:$0xff]  }
   0xa   :  { %267 = vperm.xlu0 %2989, %v109_v8   ;;  %187 = vperm.xlu1 %2990, %v93_v12   ;;  %v2571_v25 = vadd.f32 %v2570_v17, %v2569_v21  ;;  %v2998_v36 = vld [vmem:[%s5126_s2 + $0x58] sm:$0xff]   ;;  %v2999_v37 = vld [vmem:[%s5126_s2 + $0x20] sm:$0xff]   ;;  %v88_v40 = vld [vmem:[%s5127_s3 + $0x50] sm:$0xff] }
   0xb   :  { %2949 = vmatprep.subr.bf16.mxu0 %v76_v13  ;;  %2984 = vmatprep.subr.bf16.mxu1 %v76_v13  ;;  %v3000_v38 = vld [vmem:[%s5126_s2 + $0x60] sm:$0xff]   ;;  %v89_v39 = vld [vmem:[%s5127_s3 + $0x58] sm:$0xff]  ;;  %v103_v41 = vld [vmem:[%s5127_s3 + $0xc8] sm:$0xff] }
   0xc   :  { %v3625_v30 = vadd.f32 %v2572_v22, %v2571_v25  ;;  %v102_v42 = vld [vmem:[%s5127_s3 + $0xc0] sm:$0xff]  ;;  %v3001_v43 = vld [vmem:[%s5126_s2 + $0x28] sm:$0xff]   ;;  %v3003_v45 = vld [vmem:[%s5126_s2 + $0x30] sm:$0xff]  }
   0xd   :  { %2950 = vmatpush3.bf16.msra.mxu0 %v76_v13  ;;  %2986 = vmatpush3.bf16.msra.mxu1 %v76_v13  ;;  %v3002_v44 = vld [vmem:[%s5126_s2 + $0x68] sm:$0xff]   ;;  %v3004_v46 = vld [vmem:[%s5126_s2 + $0x70] sm:$0xff]   ;;  %v86_v48 = vld [vmem:[%s5127_s3 + $0x40] sm:$0xff] }
   0xe   :  { %5139 = vst [vmem:[#allocation7_spill] sm:$0xff] %v3625_v30  ;;  %252 = vperm.xlu0 %2989, %v106_v23   ;;  %257 = vperm.xlu1 %2990, %v107_v24   ;;  %v87_v47 = vld [vmem:[%s5127_s3 + $0x48] sm:$0xff]  ;;  %v101_v49 = vld [vmem:[%s5127_s3 + $0xb8] sm:$0xff]  ;;  %v100_v50 = vld [vmem:[%s5127_s3 + $0xb0] sm:$0xff] }
   0xf   :  { %v3005_v51 = vld [vmem:[%s5126_s2 + $0x38] sm:$0xff]   ;;  %v84_v54 = vld [vmem:[%s5127_s3 + $0x30] sm:$0xff]  ;;  %v99_v55 = vld [vmem:[%s5127_s3 + $0xa8] sm:$0xff] }
  0x10   :  { %2952 = vmatmul.mubr.msk.bf16.vlgmr.msra.gmra.mxu0 %vm350_vm1, %v2993_v26  ;;  %2968 = vmatmul.mubr.msk.bf16.vlgmr.msra.gmra.mxu1 %vm350_vm1, %v2994_v27  ;;  %v3006_v52 = vld [vmem:[%s5126_s2 + $0x78] sm:$0xff]   ;;  %v98_v56 = vld [vmem:[%s5127_s3 + $0xa0] sm:$0xff]  ;;  %v83_v57 = vld [vmem:[%s5127_s3 + $0x28] sm:$0xff] }
  0x11   :  { %2955 = vmatprep.mubr.msk.bf16.mxu0 %vm350_vm1, %v2995_v29  ;;  %2971 = vmatprep.mubr.msk.bf16.mxu1 %vm350_vm1, %v2996_v31  ;;  %v85_v53 = vld [vmem:[%s5127_s3 + $0x38] sm:$0xff]  ;;  %v82_v58 = vld [vmem:[%s5127_s3 + $0x20] sm:$0xff]  ;;  %v96_v60 = vld [vmem:[%s5127_s3 + $0x90] sm:$0xff] }
  0x12   :  { %177 = vperm.xlu1 %2990, %v91_v28   ;;  %172 = vperm.xlu0 %2989, %v90_v32   ;;  %v97_v59 = vld [vmem:[%s5127_s3 + $0x98] sm:$0xff]  ;;  %v80_v62 = vld [vmem:[%s5127_s3 + $0x10] sm:$0xff]  ;;  %v95_v63 = vld [vmem:[%s5127_s3 + $0x88] sm:$0xff] }
  0x13   :  { %v81_v61 = vld [vmem:[%s5127_s3 + $0x18] sm:$0xff]  ;;  %v94_v0 = vld [vmem:[%s5127_s3 + $0x80] sm:$0xff]  ;;  %v79_v1 = vld [vmem:[%s5127_s3 + $0x8] sm:$0xff] }
  0x14   :  { %v78_v2 = vld [vmem:[%s5127_s3] sm:$0xff]  ;;  %v831_v3 = vld [vmem:[%s5129_s5 + $0xf8] sm:$0xff]  ;;  %v830_v4 = vld [vmem:[%s5129_s5 + $0xf0] sm:$0xff] }
  0x15   :  { %v815_v5 = vld [vmem:[%s5129_s5 + $0x78] sm:$0xff]  ;;  %v814_v6 = vld [vmem:[%s5129_s5 + $0x70] sm:$0xff]  ;;  %v829_v7 = vld [vmem:[%s5129_s5 + $0xe8] sm:$0xff] }
  0x16   :  { %247 = vperm.xlu1 %2990, %v105_v33   ;;  %242 = vperm.xlu0 %2989, %v104_v34   ;;  %v828_v8 = vld [vmem:[%s5129_s5 + $0xe0] sm:$0xff] }
  0x18   :  { %2956 = vmatmul.mubr.msk.bf16.gmra.mxu0 %vm350_vm1, %v2997_v35  ;;  %2972 = vmatmul.mubr.msk.bf16.gmra.mxu1 %vm350_vm1, %v2998_v36 }
  0x19   :  { %2959 = vmatprep.mubr.msk.bf16.mxu0 %vm350_vm1, %v2999_v37  ;;  %2975 = vmatprep.mubr.msk.bf16.mxu1 %vm350_vm1, %v3000_v38 }
  0x1a   :  { %167 = vperm.xlu1 %2990, %v89_v39   ;;  %162 = vperm.xlu0 %2989, %v88_v40  }
  0x1e   :  { %237 = vperm.xlu1 %2990, %v103_v41   ;;  %232 = vperm.xlu0 %2989, %v102_v42  }
  0x20   :  { %2960 = vmatmul.mubr.msk.bf16.gmra.mxu0 %vm350_vm1, %v3001_v43  ;;  %2976 = vmatmul.mubr.msk.bf16.gmra.mxu1 %vm350_vm1, %v3002_v44 }
  0x21   :  { %2963 = vmatprep.mubr.msk.bf16.mxu0 %vm350_vm1, %v3003_v45  ;;  %2979 = vmatprep.mubr.msk.bf16.mxu1 %vm350_vm1, %v3004_v46 }
  0x22   :  { %157 = vperm.xlu1 %2990, %v87_v47   ;;  %152 = vperm.xlu0 %2989, %v86_v48  }
  0x26   :  { %227 = vperm.xlu1 %2990, %v101_v49   ;;  %222 = vperm.xlu0 %2989, %v100_v50  }
  0x28   :  { %2964 = vmatmul.mubr.msk.bf16.gmra.mxu0 %vm350_vm1, %v3005_v51  ;;  %2980 = vmatmul.mubr.msk.bf16.gmra.mxu1 %vm350_vm1, %v3006_v52 }
  0x2a   :  { %147 = vperm.xlu1 %2990, %v85_v53   ;;  %142 = vperm.xlu0 %2989, %v84_v54  }
  0x2e   :  { %217 = vperm.xlu1 %2990, %v99_v55   ;;  %212 = vperm.xlu0 %2989, %v98_v56  }
  0x32   :  { %137 = vperm.xlu1 %2990, %v83_v57   ;;  %132 = vperm.xlu0 %2989, %v82_v58  }
  0x36   :  { %207 = vperm.xlu1 %2990, %v97_v59   ;;  %202 = vperm.xlu0 %2989, %v96_v60  }
  0x3a   :  { %127 = vperm.xlu1 %2990, %v81_v61   ;;  %122 = vperm.xlu0 %2989, %v80_v62  }
  0x3e   :  { %197 = vperm.xlu1 %2990, %v95_v63   ;;  %192 = vperm.xlu0 %2989, %v94_v0  }
  0x42   :  { %117 = vperm.xlu1 %2990, %v79_v1   ;;  %112 = vperm.xlu0 %2989, %v78_v2  }
  0x46   :  { %989 = vperm.xlu1 %2990, %v831_v3   ;;  %984 = vperm.xlu0 %2989, %v830_v4  }
  0x4a   :  { %909 = vperm.xlu1 %2990, %v815_v5   ;;  %904 = vperm.xlu0 %2989, %v814_v6  }
  0x4b   :  { %18 = vsyncpa [#allocation5], 0  ;;  %v813_v9 = vld [vmem:[%s5129_s5 + $0x68] sm:$0xff]  ;;  %v812_v10 = vld [vmem:[%s5129_s5 + $0x60] sm:$0xff]  ;;  %s3512_s15 = smov [#allocation4]   ;;  %vm2593_vm4 = vcmask 57344  }
  0x4c   :  { %v827_v11 = vld [vmem:[%s5129_s5 + $0xd8] sm:$0xff]  ;;  %v826_v12 = vld [vmem:[%s5129_s5 + $0xd0] sm:$0xff]  ;;  %v825_v15 = vld [vmem:[%s5129_s5 + $0xc8] sm:$0xff] }
  0x4d   :  { %v811_v13 = vld [vmem:[%s5129_s5 + $0x58] sm:$0xff]  ;;  %v810_v14 = vld [vmem:[%s5129_s5 + $0x50] sm:$0xff]  ;;  %v824_v16 = vld [vmem:[%s5129_s5 + $0xc0] sm:$0xff] }
  0x4e   :  { %979 = vperm.xlu1 %2990, %v829_v7   ;;  %974 = vperm.xlu0 %2989, %v828_v8   ;;  %v809_v17 = vld [vmem:[%s5129_s5 + $0x48] sm:$0xff]  ;;  %v808_v18 = vld [vmem:[%s5129_s5 + $0x40] sm:$0xff]  ;;  %v823_v19 = vld [vmem:[%s5129_s5 + $0xb8] sm:$0xff] }
  0x4f   :  { %v822_v20 = vld [vmem:[%s5129_s5 + $0xb0] sm:$0xff]  ;;  %v807_v21 = vld [vmem:[%s5129_s5 + $0x38] sm:$0xff]  ;;  %v821_v23 = vld [vmem:[%s5129_s5 + $0xa8] sm:$0xff] }
  0x50   :  { %v806_v22 = vld [vmem:[%s5129_s5 + $0x30] sm:$0xff]  ;;  %v820_v24 = vld [vmem:[%s5129_s5 + $0xa0] sm:$0xff]  ;;  %v805_v25 = vld [vmem:[%s5129_s5 + $0x28] sm:$0xff] }
  0x51   :  { %v804_v26 = vld [vmem:[%s5129_s5 + $0x20] sm:$0xff]  ;;  %v819_v27 = vld [vmem:[%s5129_s5 + $0x98] sm:$0xff]  ;;  %v818_v28 = vld [vmem:[%s5129_s5 + $0x90] sm:$0xff] }
  0x52   :  { %899 = vperm.xlu1 %2990, %v813_v9   ;;  %894 = vperm.xlu0 %2989, %v812_v10   ;;  %v803_v29 = vld [vmem:[%s5129_s5 + $0x18] sm:$0xff]  ;;  %v802_v31 = vld [vmem:[%s5129_s5 + $0x10] sm:$0xff]  ;;  %v817_v32 = vld [vmem:[%s5129_s5 + $0x88] sm:$0xff] }
  0x53   :  { %v816_v33 = vld [vmem:[%s5129_s5 + $0x80] sm:$0xff]  ;;  %v801_v34 = vld [vmem:[%s5129_s5 + $0x8] sm:$0xff]  ;;  %v1556_v38 = vld [vmem:[%s5131_s7 + $0x18] sm:$0xff] }
  0x54   :  { %v800_v35 = vld [vmem:[%s5129_s5] sm:$0xff]  ;;  %v1554_v36 = vld [vmem:[%s5131_s7 + $0x8] sm:$0xff]  ;;  %v1555_v39 = vld [vmem:[%s5131_s7 + $0x10] sm:$0xff] }
  0x55   :  { %v1553_v37 = vld [vmem:[%s5131_s7] sm:$0xff]  ;;  %v1558_v41 = vld [vmem:[%s5131_s7 + $0x28] sm:$0xff]  ;;  %v1560_v44 = vld [vmem:[%s5131_s7 + $0x38] sm:$0xff] }
  0x56   :  { %969 = vperm.xlu1 %2990, %v827_v11   ;;  %964 = vperm.xlu0 %2989, %v826_v12   ;;  %v1557_v42 = vld [vmem:[%s5131_s7 + $0x20] sm:$0xff]  ;;  %v1559_v45 = vld [vmem:[%s5131_s7 + $0x30] sm:$0xff]  ;;  %v1562_v47 = vld [vmem:[%s5131_s7 + $0x48] sm:$0xff] }
  0x57   :  { %v1561_v48 = vld [vmem:[%s5131_s7 + $0x40] sm:$0xff]  ;;  %v1564_v51 = vld [vmem:[%s5131_s7 + $0x58] sm:$0xff]  ;;  %v1563_v52 = vld [vmem:[%s5131_s7 + $0x50] sm:$0xff] }
  0x58   :  { %v1566_v54 = vld [vmem:[%s5131_s7 + $0x68] sm:$0xff]  ;;  %v1565_v55 = vld [vmem:[%s5131_s7 + $0x60] sm:$0xff]  ;;  %v1568_v57 = vld [vmem:[%s5131_s7 + $0x78] sm:$0xff] }
  0x59   :  { %v1567_v58 = vld [vmem:[%s5131_s7 + $0x70] sm:$0xff]  ;;  %v1570_v61 = vld [vmem:[%s5131_s7 + $0x88] sm:$0xff]  ;;  %v1569_v62 = vld [vmem:[%s5131_s7 + $0x80] sm:$0xff] }
  0x5a   :  { %889 = vperm.xlu1 %2990, %v811_v13   ;;  %884 = vperm.xlu0 %2989, %v810_v14   ;;  %v1572_v0 = vld [vmem:[%s5131_s7 + $0x98] sm:$0xff]  ;;  %v1571_v1 = vld [vmem:[%s5131_s7 + $0x90] sm:$0xff]  ;;  %v1574_v3 = vld [vmem:[%s5131_s7 + $0xa8] sm:$0xff] }
  0x5b   :  { %v1573_v4 = vld [vmem:[%s5131_s7 + $0xa0] sm:$0xff]  ;;  %v1576_v7 = vld [vmem:[%s5131_s7 + $0xb8] sm:$0xff]  ;;  %v1575_v8 = vld [vmem:[%s5131_s7 + $0xb0] sm:$0xff] }
  0x5c   :  { %v1578_v10 = vld [vmem:[%s5131_s7 + $0xc8] sm:$0xff]  ;;  %v1577_v11 = vld [vmem:[%s5131_s7 + $0xc0] sm:$0xff]  ;;  %v1580_v13 = vld [vmem:[%s5131_s7 + $0xd8] sm:$0xff] }
  0x5d   :  { %v1579_v14 = vld [vmem:[%s5131_s7 + $0xd0] sm:$0xff] }
  0x5e   :  { %959 = vperm.xlu1 %2990, %v825_v15   ;;  %954 = vperm.xlu0 %2989, %v824_v16  }
  0x62   :  { %879 = vperm.xlu1 %2990, %v809_v17   ;;  %874 = vperm.xlu0 %2989, %v808_v18   ;;  %v2258_v17 = vld [vmem:[%s5132_s8] sm:$0xff] }
  0x63   :  { %v1581_v18 = vld [vmem:[%s5131_s7 + $0xe0] sm:$0xff] }
  0x66   :  { %949 = vperm.xlu1 %2990, %v823_v19   ;;  %944 = vperm.xlu0 %2989, %v822_v20   ;;  %v2260_v20 = vld [vmem:[%s5132_s8 + $0x10] sm:$0xff] }
  0x6a   :  { %869 = vperm.xlu1 %2990, %v807_v21   ;;  %864 = vperm.xlu0 %2989, %v806_v22   ;;  %v2259_v21 = vld [vmem:[%s5132_s8 + $0x8] sm:$0xff] }
  0x6e   :  { %939 = vperm.xlu1 %2990, %v821_v23   ;;  %934 = vperm.xlu0 %2989, %v820_v24   ;;  %v2262_v23 = vld [vmem:[%s5132_s8 + $0x20] sm:$0xff]  ;;  %v2261_v24 = vld [vmem:[%s5132_s8 + $0x18] sm:$0xff] }
  0x72   :  { %859 = vperm.xlu1 %2990, %v805_v25   ;;  %854 = vperm.xlu0 %2989, %v804_v26   ;;  %v3009_v26 = vld [vmem:[%s5128_s4 + $0x4] ss:$8 sps:$4 sm:$0xff]  }
  0x73   :  { %1184 = vmatprep.mubr.bf16.mxu1 %v3009_v26 }
  0x76   :  { %929 = vperm.xlu1 %2990, %v819_v27   ;;  %924 = vperm.xlu0 %2989, %v818_v28   ;;  %v2264_v28 = vld [vmem:[%s5132_s8 + $0x30] sm:$0xff] }
  0x7a   :  { %849 = vperm.xlu1 %2990, %v803_v29   ;;  %844 = vperm.xlu0 %2989, %v802_v31   ;;  %v2263_v29 = vld [vmem:[%s5132_s8 + $0x28] sm:$0xff] }
  0x7e   :  { %919 = vperm.xlu1 %2990, %v817_v32   ;;  %914 = vperm.xlu0 %2989, %v816_v33   ;;  %v2266_v32 = vld [vmem:[%s5132_s8 + $0x40] sm:$0xff]  ;;  %v2265_v33 = vld [vmem:[%s5132_s8 + $0x38] sm:$0xff] }
  0x80   :  { %v3857_v40 = vpop.permute.xlu0 %262  ;;  %v3865_v43 = vpop.permute.xlu1 %182 }
  0x82   :  { %839 = vperm.xlu1 %2990, %v801_v34   ;;  %834 = vperm.xlu0 %2989, %v800_v35   ;;  %v1582_v35 = vld [vmem:[%s5131_s7 + $0xe8] sm:$0xff] }
  0x85   :  { %v3873_v46 = vpop.permute.xlu0 %267  ;;  %v3881_v49 = vpop.permute.xlu1 %187 }
  0x86   :  { %1592 = vperm.xlu1 %2990, %v1554_v36   ;;  %1587 = vperm.xlu0 %2989, %v1553_v37   ;;  %v2267_v36 = vld [vmem:[%s5132_s8 + $0x48] sm:$0xff] }
  0x89   :  { %v3883_v50 = vpop.permute.xlu0 %252  ;;  %v3891_v53 = vpop.permute.xlu1 %257 }
  0x8a   :  { %1602 = vperm.xlu1 %2990, %v1556_v38   ;;  %1597 = vperm.xlu0 %2989, %v1555_v39  }
  0x8d   :  { %v3899_v56 = vpop.permute.xlu0 %172  ;;  %v3907_v59 = vpop.permute.xlu1 %177 }
  0x8e   :  { %1612 = vperm.xlu1 %2990, %v1558_v41   ;;  %1607 = vperm.xlu0 %2989, %v1557_v42  }
  0x91   :  { %v3909_v60 = vpop.permute.xlu0 %242  ;;  %v3917_v63 = vpop.permute.xlu1 %247 }
  0x92   :  { %1622 = vperm.xlu1 %2990, %v1560_v44   ;;  %1617 = vperm.xlu0 %2989, %v1559_v45   ;;  %v1583_v45 = vld [vmem:[%s5131_s7 + $0xf0] sm:$0xff] }
  0x95   :  { %v3925_v2 = vpop.permute.xlu0 %162  ;;  %v3933_v5 = vpop.permute.xlu1 %167 }
  0x96   :  { %1632 = vperm.xlu1 %2990, %v1562_v47   ;;  %1627 = vperm.xlu0 %2989, %v1561_v48   ;;  %v2268_v47 = vld [vmem:[%s5132_s8 + $0x50] sm:$0xff] }
  0x99   :  { %v3935_v6 = vpop.permute.xlu0 %232  ;;  %v3943_v9 = vpop.permute.xlu1 %237 }
  0x9a   :  { %1642 = vperm.xlu1 %2990, %v1564_v51   ;;  %1637 = vperm.xlu0 %2989, %v1563_v52  }
  0x9d   :  { %v3951_v12 = vpop.permute.xlu0 %152  ;;  %v3959_v15 = vpop.permute.xlu1 %157 }
  0x9e   :  { %1652 = vperm.xlu1 %2990, %v1566_v54   ;;  %1647 = vperm.xlu0 %2989, %v1565_v55  }
  0xa1   :  { %v3961_v16 = vpop.permute.xlu0 %222  ;;  %v3969_v19 = vpop.permute.xlu1 %227 }
  0xa2   :  { %1662 = vperm.xlu1 %2990, %v1568_v57   ;;  %1657 = vperm.xlu0 %2989, %v1567_v58   ;;  %v1584_v57 = vld [vmem:[%s5131_s7 + $0xf8] sm:$0xff]  ;;  %s2601_s7 = sshll.u32 %s3512_s15, 4  ;;  %s2602_s7 = int_to_ptr.vmem [resolvable:$true] %s2601_s7 }
  0xa3   :  { %v2269_v58 = vld [vmem:[%s5132_s8 + $0x58] sm:$0xff]  ;;  %s3489_s16 = scalar_lea.vmem %s2602_s7, 16  ;;  %s3493_s17 = scalar_lea.vmem %s2602_s7, 32 }
  0xa4   :  { %p3490_p0 = scmp.ne.s32.totalorder %s2602_s7, %s3489_s16  ;;  %p3494_p1 = scmp.lt.s32.totalorder %s2602_s7, %s2602_s7 }
  0xa5   :  { %v3977_v22 = vpop.permute.xlu0 %142  ;;  %v3985_v25 = vpop.permute.xlu1 %147  ;;  %p3495_p2 = scmp.lt.s32.totalorder %s3493_s17, %s3489_s16 }
  0xa6   :  { %1672 = vperm.xlu1 %2990, %v1570_v61   ;;  %1667 = vperm.xlu0 %2989, %v1569_v62  }
  0xa7   :  { %p3496_p3 = por %p3495_p2, %p3494_p1 }
  0xa9   :  { %v3990_v27 = vpop.permute.xlu0 %212  ;;  %v3998_v31 = vpop.permute.xlu1 %217  ;;  %p3497_p4 = pnand %p3496_p3, %p3490_p0 }
  0xaa   :  { %1682 = vperm.xlu1 %2990, %v1572_v0   ;;  %1677 = vperm.xlu0 %2989, %v1571_v1  }
  0xad   :  { %v4006_v34 = vpop.permute.xlu0 %132  ;;  %v4014_v39 = vpop.permute.xlu1 %137 }
  0xae   :  { %1692 = vperm.xlu1 %2990, %v1574_v3   ;;  %1687 = vperm.xlu0 %2989, %v1573_v4   ;;  %v2271_v4 = vld [vmem:[%s5132_s8 + $0x68] sm:$0xff] }
  0xb1   :  { %v203_v44 = vpop.permute.xlu0 %202  ;;  %v208_v55 = vpop.permute.xlu1 %207 }
  0xb2   :  { %1702 = vperm.xlu1 %2990, %v1576_v7   ;;  %1697 = vperm.xlu0 %2989, %v1575_v8   ;;  %v2270_v7 = vld [vmem:[%s5132_s8 + $0x60] sm:$0xff] }
  0xb5   :  { %v123_v0 = vpop.permute.xlu0 %122 }
  0xb6   :  { %1712 = vperm.xlu1 %2990, %v1578_v10   ;;  %1707 = vperm.xlu0 %2989, %v1577_v11   ;;  %v128_v11 = vpop.permute.xlu1 %127 }
  0xba   :  { %1722 = vperm.xlu1 %2990, %v1580_v13   ;;  %1717 = vperm.xlu0 %2989, %v1579_v14  }
  0xbe   :  { %2292 = vperm.xlu1 %2990, %v2258_v17   ;;  %1727 = vperm.xlu0 %2989, %v1581_v18   ;;  %v193_v17 = vpop.permute.xlu0 %192  ;;  %v2273_v18 = vld [vmem:[%s5132_s8 + $0x78] sm:$0xff] }
  0xc2   :  { %2302 = vperm.xlu1 %2990, %v2260_v20   ;;  %2297 = vperm.xlu0 %2989, %v2259_v21   ;;  %v2272_v20 = vld [vmem:[%s5132_s8 + $0x70] sm:$0xff] }
  0xc6   :  { %2312 = vperm.xlu1 %2990, %v2262_v23   ;;  %2307 = vperm.xlu0 %2989, %v2261_v24  }
  0xca   :  { %2322 = vperm.xlu1 %2990, %v2264_v28   ;;  %2317 = vperm.xlu0 %2989, %v2263_v29   ;;  %v2275_v28 = vld [vmem:[%s5132_s8 + $0x88] sm:$0xff]  ;;  %v2274_v29 = vld [vmem:[%s5132_s8 + $0x80] sm:$0xff] }
  0xce   :  { %2332 = vperm.xlu1 %2990, %v2266_v32   ;;  %2327 = vperm.xlu0 %2989, %v2265_v33   ;;  %v198_v32 = vpop.permute.xlu1 %197 }
  0xd0   :  { %v2953_v37 = vpop.f32.mrf.mxu0  ;;  %v2969_v38 = vpop.f32.mrf.mxu1 }
  0xd2   :  { %v433_v41 = vpop.f32.mrf.mxu0  ;;  %v497_v42 = vpop.f32.mrf.mxu1  ;;  %1732 = vperm.xlu1 %2990, %v1582_v35   ;;  %2337 = vperm.xlu0 %2989, %v2267_v36   ;;  %v4066_v35 = vadd.f32 %v2953_v37, %v123_v0 }
  0xd3   :  { %v113_v36 = vpop.permute.xlu0 %112  ;;  %v4080_v37 = vadd.f32 %v497_v42, %v193_v17  ;;  %v118_v0 = vpop.permute.xlu1 %117  ;;  %v2279_v42 = vld [vmem:[%s5132_s8 + $0xa8] sm:$0xff] }
  0xd4   :  { %v2954_v48 = vpop.f32.mrf.mxu0  ;;  %v2970_v51 = vpop.f32.mrf.mxu1 }
  0xd5   :  { %5141 = vst [vmem:[#allocation9_spill] sm:$0xff] %v4080_v37 }
  0xd6   :  { %v436_v52 = vpop.f32.mrf.mxu0  ;;  %v500_v54 = vpop.f32.mrf.mxu1  ;;  %1737 = vperm.xlu1 %2990, %v1583_v45   ;;  %2342 = vperm.xlu0 %2989, %v2268_v47   ;;  %v4068_v45 = vadd.f32 %v2969_v38, %v203_v44  ;;  %v562_v38 = vsub.f32 0.0, %v4066_v35  ;;  %v4083_v44 = vadd.f32 %v2954_v48, %v128_v11  ;;  %v2278_v48 = vld [vmem:[%s5132_s8 + $0xa0] sm:$0xff] }
  0xd8   :  { %v2957_v61 = vpop.f32.mrf.mxu0  ;;  %v2973_v62 = vpop.f32.mrf.mxu1  ;;  %v596_v11 = vmul.f32 1.442695, %v562_v38  ;;  %v563_v17 = vsub.f32 0.0, %v4083_v44 }
  0xda   :  { %v4028_v1 = vpop.f32.mrf.mxu0  ;;  %v4030_v3 = vpop.f32.mrf.mxu1  ;;  %1742 = vperm.xlu1 %2990, %v1584_v57   ;;  %2347 = vperm.xlu0 %2989, %v2269_v58   ;;  %v4070_v57 = vadd.f32 %v433_v41, %v113_v36  ;;  %v578_v41 = vsub.f32 0.0, %v4068_v45  ;;  %3103 = vpow2.f32 %v596_v11 }
  0xdb   :  { %v4124_v38 = vadd.f32 %v4030_v3, %v3990_v27 }
  0xdc   :  { %v4038_v8 = vpop.f32.mrf.mxu0  ;;  %v4040_v10 = vpop.f32.mrf.mxu1  ;;  %5140 = vst [vmem:[#allocation8_spill] sm:$0xff] %v4070_v57 }
  0xde   :  { %v4042_v13 = vpop.f32.mrf.mxu0  ;;  %v4044_v14 = vpop.f32.mrf.mxu1  ;;  %2357 = vperm.xlu1 %2990, %v2271_v4   ;;  %2352 = vperm.xlu0 %2989, %v2270_v7   ;;  %v2277_v4 = vld [vmem:[%s5132_s8 + $0x98] sm:$0xff]  ;;  %v2276_v7 = vld [vmem:[%s5132_s8 + $0x90] sm:$0xff] }
  0xe0   :  { %v4052_v21 = vpop.f32.mrf.mxu0  ;;  %v2977_v23 = vpop.f32.mrf.mxu1 }
  0xe2   :  { %v4054_v24 = vpop.f32.mrf.mxu0  ;;  %v4056_v26 = vpop.f32.mrf.mxu1  ;;  %2367 = vperm.xlu1 %2990, %v2273_v18   ;;  %2362 = vperm.xlu0 %2989, %v2272_v20   ;;  %v4086_v18 = vadd.f32 %v2970_v51, %v208_v55  ;;  %v576_v51 = vsub.f32 0.0, %v4080_v37  ;;  %v4100_v55 = vadd.f32 %v500_v54, %v198_v32  ;;  %v4113_v54 = vadd.f32 %v4028_v1, %v4006_v34 }
  0xe3   :  { %v4129_v1 = vadd.f32 %v4038_v8, %v3985_v25  ;;  %v2283_v25 = vld [vmem:[%s5132_s8 + $0xc8] sm:$0xff] }
  0xe4   :  { %v4064_v33 = vpop.f32.mrf.mxu0  ;;  %v2978_v47 = vpop.f32.mrf.mxu1  ;;  %v564_v3 = vsub.f32 0.0, %v4113_v54 }
  0xe5   :  { %v4137_v11 = vadd.f32 %v2978_v47, %v3917_v63  ;;  %v567_v63 = vsub.f32 0.0, %v4129_v1 }
  0xe6   :  { %2377 = vperm.xlu1 %2990, %v2275_v28   ;;  %2372 = vperm.xlu0 %2989, %v2274_v29   ;;  %v4072_v58 = vpop.f32.mrf.mxu0  ;;  %v4088_v20 = vpop.f32.mrf.mxu1  ;;  %v560_v28 = vsub.f32 0.0, %v4070_v57  ;;  %v4091_v29 = vadd.f32 %v436_v52, %v118_v0  ;;  %v628_v52 = vmul.f32 1.442695, %v578_v41  ;;  %v4108_v0 = vadd.f32 %v2973_v62, %v3961_v16  ;;  %v2280_v16 = vld [vmem:[%s5132_s8 + $0xb0] sm:$0xff] }
  0xe7   :  { %v577_v62 = vsub.f32 0.0, %v4100_v55  ;;  %v598_v41 = vmul.f32 1.442695, %v563_v17 }
  0xe8   :  { %v2965_v36 = vpop.f32.mrf.mxu0  ;;  %v2981_v30 = vpop.f32.mrf.mxu1  ;;  %v592_v57 = vmul.f32 1.442695, %v560_v28  ;;  %v561_v37 = vsub.f32 0.0, %v4091_v29  ;;  %3105 = vpow2.f32 %v628_v52 }
  0xe9   :  { %v626_v8 = vmul.f32 1.442695, %v577_v62  ;;  %v4151_v47 = vadd.f32 %v2981_v30, %v3857_v40  ;;  %v2285_v30 = vld [vmem:[%s5132_s8 + $0xd8] sm:$0xff]  ;;  %v2284_v40 = vld [vmem:[%s5132_s8 + $0xd0] sm:$0xff] }
  0xea   :  { %2387 = vperm.xlu1 %2990, %v2277_v4   ;;  %2382 = vperm.xlu0 %2989, %v2276_v7   ;;  %v4104_v4 = vadd.f32 %v2957_v61, %v3977_v22  ;;  %v579_v7 = vsub.f32 0.0, %v4086_v18  ;;  %v481_v32 = vpop.f32.mrf.mxu0  ;;  %v2281_v22 = vld [vmem:[%s5132_s8 + $0xb8] sm:$0xff]  ;;  %v624_v61 = vmul.f32 1.442695, %v576_v51  ;;  %v545_v51 = vpop.f32.mrf.mxu1  ;;  %3107 = vpow2.f32 %v592_v57 }
  0xeb   :  { %v594_v27 = vmul.f32 1.442695, %v561_v37  ;;  %v4147_v57 = vadd.f32 %v2965_v36, %v3865_v43  ;;  %v600_v43 = vmul.f32 1.442695, %v564_v3  ;;  %v587_v36 = vsub.f32 0.0, %v4137_v11 }
  0xec   :  { %v566_v34 = vsub.f32 0.0, %v4104_v4  ;;  %v630_v28 = vmul.f32 1.442695, %v579_v7  ;;  %v2966_v17 = vpop.f32.mrf.mxu0  ;;  %3109 = vpow2.f32 %v624_v61  ;;  %v4159_v61 = vadd.f32 %v545_v51, %v3883_v50 }
  0xed   :  { %3111 = vpow2.f32 %v598_v41  ;;  %v4169_v41 = vadd.f32 %v2966_v17, %v3881_v49  ;;  %v590_v50 = vsub.f32 0.0, %v4151_v47  ;;  %v4181_v49 = vadd.f32 %v4052_v21, %v3925_v2 }
  0xee   :  { %2397 = vperm.xlu1 %2990, %v2279_v42   ;;  %2392 = vperm.xlu0 %2989, %v2278_v48   ;;  %v582_v42 = vsub.f32 0.0, %v4108_v0  ;;  %v4133_v48 = vadd.f32 %v2977_v23, %v3909_v60  ;;  %v2282_v60 = vld [vmem:[%s5132_s8 + $0xc0] sm:$0xff]  ;;  %v580_v23 = vsub.f32 0.0, %v4124_v38  ;;  %v604_v37 = vmul.f32 1.442695, %v566_v34  ;;  %v484_v62 = vpop.f32.mrf.mxu0 }
  0xef   :  { %3113 = vpow2.f32 %v630_v28  ;;  %v606_v34 = vmul.f32 1.442695, %v567_v63  ;;  %v646_v3 = vmul.f32 1.442695, %v587_v36  ;;  %v588_v17 = vsub.f32 0.0, %v4159_v61  ;;  %v4200_v63 = vpop.eup %3103 }
  0xf0   :  { %v636_v52 = vmul.f32 1.442695, %v582_v42  ;;  %v586_v7 = vsub.f32 0.0, %v4133_v48  ;;  %3115 = vpow2.f32 %v594_v27  ;;  %v4177_v27 = vadd.f32 %v484_v62, %v3907_v59 }
  0xf1   :  { %3117 = vpow2.f32 %v626_v8  ;;  %v4192_v59 = vadd.f32 %v4064_v33, %v3933_v5  ;;  %v575_v2 = vsub.f32 0.0, %v4169_v41  ;;  %v4197_v8 = vadd.f32 %v4088_v20, %v3943_v9 }
  0xf2   :  { %2407 = vperm.xlu1 %2990, %v2281_v22   ;;  %2402 = vperm.xlu0 %2989, %v2280_v16   ;;  %v4155_v22 = vadd.f32 %v481_v32, %v3899_v56  ;;  %v2982_v16 = vpop.f32.mrf.mxu1  ;;  %v632_v56 = vmul.f32 1.442695, %v580_v23  ;;  %v574_v32 = vsub.f32 0.0, %v4147_v57  ;;  %3119 = vpow2.f32 %v604_v37 }
  0xf3   :  { %v4173_v28 = vadd.f32 %v2982_v16, %v3873_v46  ;;  %3121 = vpow2.f32 %v636_v52  ;;  %v644_v42 = vmul.f32 1.442695, %v586_v7  ;;  %v2287_v46 = vld [vmem:[%s5132_s8 + $0xe8] sm:$0xff]  ;;  %v652_v23 = vmul.f32 1.442695, %v590_v50 }
  0xf4   :  { %v572_v51 = vsub.f32 0.0, %v4155_v22  ;;  %3123 = vpow2.f32 %v600_v43  ;;  %v548_v21 = vpop.f32.mrf.mxu1  ;;  %v4204_v52 = vadd.f32 %v4056_v26, %v3935_v6  ;;  %v573_v33 = vsub.f32 0.0, %v4177_v27  ;;  %v2289_v43 = vld [vmem:[%s5132_s8 + $0xf8] sm:$0xff]  ;;  %v2288_v6 = vld [vmem:[%s5132_s8 + $0xf0] sm:$0xff] }
  0xf5   :  { %3125 = vpow2.f32 %v632_v56  ;;  %v591_v37 = vsub.f32 0.0, %v4173_v28  ;;  %v4207_v7 = vpop.eup %3105  ;;  %v570_v9 = vsub.f32 0.0, %v4181_v49  ;;  %v648_v20 = vmul.f32 1.442695, %v588_v17 }
  0xf6   :  { %2417 = vperm.xlu1 %2990, %v2283_v25   ;;  %2412 = vperm.xlu0 %2989, %v2282_v60   ;;  %v2286_v25 = vld [vmem:[%s5132_s8 + $0xe0] sm:$0xff]  ;;  %v620_v60 = vmul.f32 1.442695, %v574_v32  ;;  %3127 = vpow2.f32 %v606_v34  ;;  %v616_v5 = vmul.f32 1.442695, %v572_v51  ;;  %v4211_v16 = vadd.f32 %v548_v21, %v3891_v53 }
  0xf7   :  { %3129 = vpow2.f32 %v644_v42  ;;  %v4219_v26 = vpop.eup %3107  ;;  %v571_v36 = vsub.f32 0.0, %v4192_v59  ;;  %v4224_v62 = vadd.f32 %v4072_v58, %v3959_v15  ;;  %v585_v56 = vsub.f32 0.0, %v4197_v8 }
  0xf8   :  { %3131 = vpow2.f32 %v646_v3  ;;  %v654_v32 = vmul.f32 1.442695, %v591_v37  ;;  %v4237_v50 = vadd.f32 %v4054_v24, %v3951_v12  ;;  %v584_v15 = vsub.f32 0.0, %v4204_v52  ;;  %v2552_v3 = vld [vmem:[#allocation3] sm:$0x1] }
  0xf9   :  { %3133 = vpow2.f32 %v620_v60  ;;  %v4226_v53 = vpop.eup %3109  ;;  %v618_v58 = vmul.f32 1.442695, %v573_v33  ;;  %v589_v51 = vsub.f32 0.0, %v4211_v16  ;;  %v4249_v12 = vadd.f32 %v4044_v14, %v3998_v31 }
  0xfa   :  { %2427 = vperm.xlu1 %2990, %v2285_v30   ;;  %2422 = vperm.xlu0 %2989, %v2284_v40   ;;  %v622_v30 = vmul.f32 1.442695, %v575_v2  ;;  %v4230_v40 = vadd.f32 %v4040_v10, %v3969_v19  ;;  %3135 = vpow2.f32 %v652_v23  ;;  %v4233_v34 = vpop.eup %3111  ;;  %v4242_v19 = vadd.f32 %v4042_v13, %v4014_v39 }
  0xfb   :  { %3137 = vpow2.f32 %v616_v5  ;;  %v612_v10 = vmul.f32 1.442695, %v570_v9  ;;  %v614_v24 = vmul.f32 1.442695, %v571_v36  ;;  %v642_v13 = vmul.f32 1.442695, %v585_v56 }
  0xfc   :  { %v3114_v42 = vpop.eup %3113  ;;  %3139 = vpow2.f32 %v648_v20  ;;  %v583_v39 = vsub.f32 0.0, %v4230_v40  ;;  %v568_v2 = vsub.f32 0.0, %v4237_v50  ;;  %v640_v21 = vmul.f32 1.442695, %v584_v15 }
  0xfd   :  { %v4245_v17 = vpop.eup %3115  ;;  %3141 = vpow2.f32 %v622_v30  ;;  %v565_v31 = vsub.f32 0.0, %v4242_v19  ;;  %v650_v14 = vmul.f32 1.442695, %v589_v51  ;;  %v581_v5 = vsub.f32 0.0, %v4249_v12 }
  0xfe   :  { %2437 = vperm.xlu1 %2990, %v2287_v46   ;;  %2432 = vperm.xlu0 %2989, %v2286_v25   ;;  %v569_v46 = vsub.f32 0.0, %v4224_v62  ;;  %v4252_v25 = vpop.eup %3117  ;;  %3143 = vpow2.f32 %v654_v32  ;;  %v638_v20 = vmul.f32 1.442695, %v583_v39 }
  0xff   :  { %v4255_v60 = vpop.eup %3119  ;;  %3145 = vpow2.f32 %v618_v58  ;;  %v602_v30 = vmul.f32 1.442695, %v565_v31  ;;  %v634_v32 = vmul.f32 1.442695, %v581_v5  ;;  %v675_v58 = vadd.f32 1.0, %v3114_v42 }
 0x100   :  { %v4258_v23 = vpop.eup %3121  ;;  %3147 = vpow2.f32 %v612_v10  ;;  %v610_v33 = vmul.f32 1.442695, %v569_v46 }
 0x101   :  { %v4261_v37 = vpop.eup %3123  ;;  %3149 = vpow2.f32 %v614_v24 }
 0x102   :  { %2447 = vperm.xlu1 %2990, %v2289_v43   ;;  %2442 = vperm.xlu0 %2989, %v2288_v6   ;;  %v4264_v9 = vpop.eup %3125  ;;  %3151 = vpow2.f32 %v642_v13  ;;  %v608_v6 = vmul.f32 1.442695, %v568_v2 }
 0x103   :  { %v4266_v43 = vpop.eup %3127  ;;  %3153 = vpow2.f32 %v640_v21 }
 0x104   :  { %v3130_v36 = vpop.eup %3129  ;;  %3155 = vpow2.f32 %v650_v14 }
 0x105   :  { %v3132_v56 = vpop.eup %3131  ;;  %3157 = vpow2.f32 %v610_v33  ;;  %v682_v2 = vadd.f32 1.0, %v3130_v36 }
 0x106   :  { %2555 = vperm.xlu0 %2989, %v2552_v3   ;;  %v3134_v15 = vpop.eup %3133  ;;  %3159 = vpow2.f32 %v638_v20  ;;  %v683_v14 = vadd.f32 1.0, %v3132_v56 }
 0x107   :  { %v3136_v10 = vpop.eup %3135  ;;  %3161 = vpow2.f32 %v608_v6  ;;  %v670_v51 = vadd.f32 1.0, %v3134_v15 }
 0x108   :  { %v3138_v3 = vpop.eup %3137  ;;  %3163 = vpow2.f32 %v602_v30  ;;  %v686_v24 = vadd.f32 1.0, %v3136_v10 }
 0x109   :  { %v3140_v46 = vpop.eup %3139  ;;  %3165 = vpow2.f32 %v634_v32  ;;  %v668_v15 = vadd.f32 1.0, %v3138_v3 }
 0x10a   :  { %v3142_v39 = vpop.eup %3141  ;;  %3167 = vrcp.f32 %v675_v58  ;;  %v684_v6 = vadd.f32 1.0, %v3140_v46 }
 0x10b   :  { %v3144_v13 = vpop.eup %3143  ;;  %3169 = vrcp.f32 %v670_v51  ;;  %v671_v21 = vadd.f32 1.0, %v3142_v39 }
 0x10c   :  { %v3146_v31 = vpop.eup %3145  ;;  %3171 = vrcp.f32 %v686_v24  ;;  %v687_v5 = vadd.f32 1.0, %v3144_v13 }
 0x10d   :  { %v3148_v42 = vpop.eup %3147  ;;  %3173 = vrcp.f32 %v671_v21  ;;  %v669_v33 = vadd.f32 1.0, %v3146_v31 }
 0x10e   :  { %v3150_v20 = vpop.eup %3149  ;;  %3175 = vrcp.f32 %v687_v5  ;;  %v666_v39 = vadd.f32 1.0, %v3148_v42  ;;  %v663_v42 = vadd.f32 1.0, %v4266_v43 }
 0x10f   :  { %v3152_v30 = vpop.eup %3151  ;;  %3177 = vrcp.f32 %v682_v2  ;;  %v667_v10 = vadd.f32 1.0, %v3150_v20  ;;  %v678_v20 = vadd.f32 1.0, %v4258_v23  ;;  %v676_v23 = vadd.f32 1.0, %v4264_v9 }
 0x110   :  { %v3154_v32 = vpop.eup %3153  ;;  %3179 = vrcp.f32 %v683_v14  ;;  %v681_v51 = vadd.f32 1.0, %v3152_v30 }
 0x111   :  { %v3156_v58 = vpop.eup %3155  ;;  %3181 = vrcp.f32 %v669_v33  ;;  %v680_v21 = vadd.f32 1.0, %v3154_v32 }
 0x112   :  { %v3158_v36 = vpop.eup %3157  ;;  %3183 = vrcp.f32 %v684_v6  ;;  %v685_v56 = vadd.f32 1.0, %v3156_v58  ;;  %v662_v58 = vadd.f32 1.0, %v4255_v60 }
 0x113   :  { %v3160_v24 = vpop.eup %3159  ;;  %3185 = vrcp.f32 %v668_v15  ;;  %v665_v31 = vadd.f32 1.0, %v3158_v36 }
 0x114   :  { %v3162_v13 = vpop.eup %3161  ;;  %3187 = vrcp.f32 %v685_v56  ;;  %v679_v3 = vadd.f32 1.0, %v3160_v24 }
 0x115   :  { %v3164_v46 = vpop.eup %3163  ;;  %3189 = vrcp.f32 %v667_v10  ;;  %v664_v5 = vadd.f32 1.0, %v3162_v13 }
 0x116   :  { %v3166_v2 = vpop.eup %3165  ;;  %3191 = vrcp.f32 %v681_v51 }
 0x117   :  { %v4268_v14 = vpop.eup %3167  ;;  %3193 = vrcp.f32 %v666_v39  ;;  %v677_v15 = vadd.f32 1.0, %v3166_v2  ;;  %v661_v39 = vadd.f32 1.0, %v3164_v46  ;;  %v674_v2 = vadd.f32 1.0, %v4207_v7 }
 0x118   :  { %v3170_v33 = vpop.eup %3169  ;;  %3195 = vrcp.f32 %v680_v21  ;;  %v658_v7 = vadd.f32 1.0, %v4200_v63 }
 0x119   :  { %v3172_v6 = vpop.eup %3171  ;;  %3197 = vrcp.f32 %v665_v31  ;;  %v734_v10 = vmul.f32 %v3170_v33, %v4147_v57  ;;  %v660_v57 = vadd.f32 1.0, %v4261_v37 }
 0x11a   :  { %v3174_v30 = vpop.eup %3173  ;;  %3199 = vrcp.f32 %v679_v3  ;;  %v750_v56 = vmul.f32 %v3172_v6, %v4151_v47  ;;  %v659_v47 = vadd.f32 1.0, %v4233_v34  ;;  %v673_v3 = vadd.f32 1.0, %v4252_v25 }
 0x11b   :  { %v3176_v32 = vpop.eup %3175  ;;  %3201 = vrcp.f32 %v664_v5  ;;  %v735_v36 = vmul.f32 %v3174_v30, %v4169_v41 }
 0x11c   :  { %v3178_v51 = vpop.eup %3177  ;;  %3203 = vrcp.f32 %v678_v20  ;;  %v751_v43 = vmul.f32 %v3176_v32, %v4173_v28 }
 0x11d   :  { %v3180_v24 = vpop.eup %3179  ;;  %3205 = vrcp.f32 %v663_v42  ;;  %v791_v13 = vpack.c.bf16 %v735_v36, %v734_v10  ;;  %v746_v42 = vmul.f32 %v3178_v51, %v4133_v48 }
 0x11e   :  { %v3182_v21 = vpop.eup %3181  ;;  %3207 = vrcp.f32 %v677_v15  ;;  %v799_v60 = vpack.c.bf16 %v751_v43, %v750_v56  ;;  %v747_v5 = vmul.f32 %v3180_v24, %v4137_v11  ;;  %v657_v11 = vadd.f32 1.0, %v4245_v17 }
 0x11f   :  { %v3184_v31 = vpop.eup %3183  ;;  %3209 = vrcp.f32 %v662_v58  ;;  %v733_v28 = vmul.f32 %v3182_v21, %v4177_v27  ;;  %v672_v27 = vadd.f32 1.0, %v4226_v53  ;;  %v656_v53 = vadd.f32 1.0, %v4219_v26 }
 0x120   :  { %v3186_v41 = vpop.eup %3185  ;;  %3211 = vrcp.f32 %v676_v23  ;;  %2723 = vmatprep.subr.bf16.mxu1 %v799_v60  ;;  %v748_v33 = vmul.f32 %v3184_v31, %v4159_v61 }
 0x121   :  { %v3188_v9 = vpop.eup %3187  ;;  %3213 = vrcp.f32 %v661_v39  ;;  %2724 = vmatpush3.bf16.msra.mxu1 %v791_v13  ;;  %v732_v6 = vmul.f32 %v3186_v41, %v4155_v22  ;;  %v797_v22 = vpack.c.bf16 %v747_v5, %v746_v42  ;;  %v3016_v42 = vld [vmem:[%s5128_s4 + $0x34] ss:$8 sps:$4 sm:$0xff]  }
 0x122   :  { %v3190_v46 = vpop.eup %3189  ;;  %v749_v37 = vmul.f32 %v3188_v9, %v4211_v16  ;;  %3215 = vrcp.f32 %v660_v57 }
 0x123   :  { %v3192_v20 = vpop.eup %3191  ;;  %3217 = vrcp.f32 %v674_v2  ;;  %v731_v61 = vmul.f32 %v3190_v46, %v4192_v59  ;;  %v790_v16 = vpack.c.bf16 %v733_v28, %v732_v6 }
 0x124   :  { %v3194_v34 = vpop.eup %3193  ;;  %v798_v30 = vpack.c.bf16 %v749_v37, %v748_v33  ;;  %3219 = vrcp.f32 %v659_v47  ;;  %v745_v63 = vmul.f32 %v3192_v20, %v4197_v8 }
 0x125   :  { %v3196_v25 = vpop.eup %3195  ;;  %3221 = vrcp.f32 %v673_v3  ;;  %v730_v48 = vmul.f32 %v3194_v34, %v4181_v49  ;;  %v3013_v34 = vld [vmem:[%s5128_s4 + $0x24] ss:$8 sps:$4 sm:$0xff]  }
 0x126   :  { %v3198_v15 = vpop.eup %3197  ;;  %2725 = vmatprep.subr.bf16.mxu1 %v798_v30  ;;  %3223 = vrcp.f32 %v658_v7  ;;  %v744_v17 = vmul.f32 %v3196_v25, %v4204_v52  ;;  %v5143_v7 = vld [vmem:[#allocation8_spill] sm:$0xff] }
 0x127   :  { %v3200_v32 = vpop.eup %3199  ;;  %2726 = vmatpush3.bf16.msra.mxu1 %v790_v16  ;;  %3225 = vrcp.f32 %v672_v27  ;;  %v789_v10 = vpack.c.bf16 %v731_v61, %v730_v48  ;;  %v729_v36 = vmul.f32 %v3198_v15, %v4224_v62  ;;  %v3015_v27 = vld [vmem:[%s5128_s4 + $0x20] ss:$8 sps:$4 sm:$0xff]   ;;  %v3018_v30 = vld [vmem:[%s5128_s4 + $0x30] ss:$8 sps:$4 sm:$0xff]   ;;  %v3019_v25 = vld [vmem:[%s5128_s4 + $0x44] ss:$8 sps:$4 sm:$0xff]  }
 0x128   :  { %v3202_v58 = vpop.eup %3201  ;;  %2727 = vmatprep.subr.bf16.mxu1 %v797_v22  ;;  %3227 = vrcp.f32 %v657_v11  ;;  %v743_v51 = vmul.f32 %v3200_v32, %v4230_v40  ;;  %v796_v23 = vpack.c.bf16 %v745_v63, %v744_v17  ;;  %v3021_v11 = vld [vmem:[%s5128_s4 + $0x40] ss:$8 sps:$4 sm:$0xff]   ;;  %v3022_v61 = vld [vmem:[%s5128_s4 + $0x54] ss:$8 sps:$4 sm:$0xff]   ;;  %v3024_v16 = vld [vmem:[%s5128_s4 + $0x50] ss:$8 sps:$4 sm:$0xff]  }
 0x129   :  { %v3204_v59 = vpop.eup %3203  ;;  %3229 = vrcp.f32 %v656_v53  ;;  %v728_v26 = vmul.f32 %v3202_v58, %v4237_v50  ;;  %v3025_v15 = vld [vmem:[%s5128_s4 + $0x64] ss:$8 sps:$4 sm:$0xff]   ;;  %v3027_v63 = vld [vmem:[%s5128_s4 + $0x60] ss:$8 sps:$4 sm:$0xff]   ;;  %v3028_v22 = vld [vmem:[%s5128_s4 + $0x74] ss:$8 sps:$4 sm:$0xff]  }
 0x12a   :  { %v3206_v8 = vpop.eup %3205  ;;  %v742_v43 = vmul.f32 %v3204_v59, %v4108_v0  ;;  %v3030_v32 = vld [vmem:[%s5128_s4 + $0x70] ss:$8 sps:$4 sm:$0xff]   ;;  %v3031_v53 = vld [vmem:[%s5128_s4 + $0x84] ss:$8 sps:$4 sm:$0xff]   ;;  %v3033_v48 = vld [vmem:[%s5128_s4 + $0x80] ss:$8 sps:$4 sm:$0xff]  }
 0x12b   :  { %v3208_v56 = vpop.eup %3207  ;;  %2728 = vmatpush3.bf16.msra.mxu1 %v789_v10  ;;  %v727_v24 = vmul.f32 %v3206_v8, %v4129_v1  ;;  %v788_v39 = vpack.c.bf16 %v729_v36, %v728_v26  ;;  %v739_v1 = vmul.f32 %v4268_v14, %v4086_v18  ;;  %v5142_v14 = vld [vmem:[#allocation9_spill] sm:$0xff]  ;;  %v3037_v59 = vld [vmem:[%s5128_s4 + $0xa4] ss:$8 sps:$4 sm:$0xff]   ;;  %v3039_v10 = vld [vmem:[%s5128_s4 + $0xa0] ss:$8 sps:$4 sm:$0xff]  }
 0x12c   :  { %v3210_v49 = vpop.eup %3209  ;;  %2729 = vmatprep.subr.bf16.mxu1 %v796_v23  ;;  %v741_v62 = vmul.f32 %v3208_v56, %v4249_v12  ;;  %v795_v21 = vpack.c.bf16 %v743_v51, %v742_v43  ;;  %v3034_v58 = vld [vmem:[%s5128_s4 + $0x94] ss:$8 sps:$4 sm:$0xff]   ;;  %v3036_v17 = vld [vmem:[%s5128_s4 + $0x90] ss:$8 sps:$4 sm:$0xff]   ;;  %v3043_v51 = vld [vmem:[%s5128_s4 + $0xc4] ss:$8 sps:$4 sm:$0xff]   ;;  %v4399_v43 = vpop.permute.xlu0 %984 }
 0x12d   :  { %v3212_v52 = vpop.eup %3211  ;;  %v726_v40 = vmul.f32 %v3210_v49, %v4104_v4  ;;  %v3040_v36 = vld [vmem:[%s5128_s4 + $0xb4] ss:$8 sps:$4 sm:$0xff]   ;;  %v3042_v8 = vld [vmem:[%s5128_s4 + $0xb0] ss:$8 sps:$4 sm:$0xff]   ;;  %v3045_v23 = vld [vmem:[%s5128_s4 + $0xc0] ss:$8 sps:$4 sm:$0xff]  }
 0x12e   :  { %v3214_v13 = vpop.eup %3213  ;;  %v740_v31 = vmul.f32 %v3212_v52, %v4124_v38  ;;  %v3046_v56 = vld [vmem:[%s5128_s4 + $0xd4] ss:$8 sps:$4 sm:$0xff]   ;;  %v3048_v26 = vld [vmem:[%s5128_s4 + $0xd0] ss:$8 sps:$4 sm:$0xff]   ;;  %v3049_v49 = vld [vmem:[%s5128_s4 + $0xe4] ss:$8 sps:$4 sm:$0xff]  }
 0x12f   :  { %2730 = vmatpush3.bf16.msra.mxu1 %v788_v39  ;;  %v3216_v60 = vpop.eup %3215  ;;  %v787_v57 = vpack.c.bf16 %v727_v24, %v726_v40  ;;  %v725_v0 = vmul.f32 %v3214_v13, %v4242_v19  ;;  %v3051_v52 = vld [vmem:[%s5128_s4 + $0xe0] ss:$8 sps:$4 sm:$0xff]   ;;  %v3052_v24 = vld [vmem:[%s5128_s4 + $0xf4] ss:$8 sps:$4 sm:$0xff]   ;;  %v4407_v39 = vpop.permute.xlu1 %989 }
 0x130   :  { %2731 = vmatprep.subr.bf16.mxu1 %v795_v21  ;;  %v3218_v50 = vpop.eup %3217  ;;  %v794_v2 = vpack.c.bf16 %v741_v62, %v740_v31  ;;  %v724_v12 = vmul.f32 %v3216_v60, %v4113_v54  ;;  %v4409_v13 = vpop.permute.xlu0 %904  ;;  %v3054_v21 = vld [vmem:[%s5128_s4 + $0xf0] ss:$8 sps:$4 sm:$0xff]  }
 0x131   :  { %v3220_v41 = vpop.eup %3219  ;;  %v738_v4 = vmul.f32 %v3218_v50, %v4068_v45 }
 0x132   :  { %v3222_v9 = vpop.eup %3221  ;;  %v723_v38 = vmul.f32 %v3220_v41, %v4083_v44  ;;  %v786_v46 = vpack.c.bf16 %v725_v0, %v724_v12 }
 0x133   :  { %2732 = vmatpush3.bf16.msra.mxu1 %v787_v57  ;;  %v3224_v47 = vpop.eup %3223  ;;  %v737_v19 = vmul.f32 %v3222_v9, %v4100_v55  ;;  %v793_v5 = vpack.c.bf16 %v739_v1, %v738_v4  ;;  %v3007_v55 = vld [vmem:[%s5128_s4] ss:$8 sps:$4 sm:$0xff]   ;;  %v4411_v62 = vpop.permute.xlu1 %909 }
 0x134   :  { %2733 = vmatprep.subr.bf16.mxu1 %v794_v2  ;;  %v3226_v28 = vpop.eup %3225  ;;  %v722_v33 = vmul.f32 %v3224_v47, %v4066_v35  ;;  %v3010_v35 = vld [vmem:[%s5128_s4 + $0x14] ss:$8 sps:$4 sm:$0xff]   ;;  %v4416_v40 = vpop.permute.xlu0 %974 }
 0x135   :  { %v3228_v3 = vpop.eup %3227  ;;  %v736_v37 = vmul.f32 %v3226_v28, %v5142_v14 }
 0x136   :  { %v3230_v18 = vpop.eup %3229  ;;  %v785_v54 = vpack.c.bf16 %v723_v38, %v722_v33  ;;  %v721_v20 = vmul.f32 %v3228_v3, %v4091_v29  ;;  %v3012_v29 = vld [vmem:[%s5128_s4 + $0x10] ss:$8 sps:$4 sm:$0xff]  }
 0x137   :  { %2734 = vmatpush3.bf16.msra.mxu1 %v786_v46  ;;  %v792_v45 = vpack.c.bf16 %v737_v19, %v736_v37  ;;  %v720_v6 = vmul.f32 %v3230_v18, %v5143_v7  ;;  %v4418_v60 = vpop.permute.xlu1 %979 }
 0x138   :  { %2735 = vmatprep.subr.bf16.mxu1 %v793_v5  ;;  %v4420_v31 = vpop.permute.xlu0 %894 }
 0x139   :  { %v784_v44 = vpack.c.bf16 %v721_v20, %v720_v6 }
 0x13b   :  { %2736 = vmatpush3.bf16.msra.mxu1 %v785_v54  ;;  %v4422_v50 = vpop.permute.xlu1 %899 }
 0x13c   :  { %2737 = vmatprep.subr.bf16.mxu1 %v792_v45  ;;  %v4424_v57 = vpop.permute.xlu0 %964 }
 0x13f   :  { %2738 = vmatpush3.bf16.msra.mxu1 %v784_v44  ;;  %v4426_v0 = vpop.permute.xlu1 %969 }
 0x140   :  { %v4428_v41 = vpop.permute.xlu0 %884 }
 0x142   :  { %1185 = vmatmul.mubr.bf16.vlgmr.msra.gmra.mxu1 %v3007_v55 }
 0x143   :  { %1192 = vmatprep.mubr.bf16.mxu1 %v3010_v35  ;;  %v4430_v1 = vpop.permute.xlu1 %889 }
 0x144   :  { %v4432_v2 = vpop.permute.xlu0 %954 }
 0x147   :  { %v4434_v9 = vpop.permute.xlu1 %959 }
 0x148   :  { %v4436_v12 = vpop.permute.xlu0 %874 }
 0x14a   :  { %1193 = vmatmul.mubr.bf16.gmra.mxu1 %v3012_v29 }
 0x14b   :  { %1200 = vmatprep.mubr.bf16.mxu1 %v3013_v34  ;;  %v4438_v47 = vpop.permute.xlu1 %879 }
 0x14c   :  { %v4440_v4 = vpop.permute.xlu0 %944 }
 0x14f   :  { %v4442_v28 = vpop.permute.xlu1 %949 }
 0x150   :  { %v4444_v38 = vpop.permute.xlu0 %864 }
 0x152   :  { %1201 = vmatmul.mubr.bf16.gmra.mxu1 %v3015_v27 }
 0x153   :  { %1208 = vmatprep.mubr.bf16.mxu1 %v3016_v42  ;;  %v4446_v46 = vpop.permute.xlu1 %869 }
 0x154   :  { %v4448_v3 = vpop.permute.xlu0 %934 }
 0x157   :  { %v4450_v19 = vpop.permute.xlu1 %939 }
 0x158   :  { %v855_v5 = vpop.permute.xlu0 %854 }
 0x15a   :  { %1209 = vmatmul.mubr.bf16.gmra.mxu1 %v3018_v30 }
 0x15b   :  { %1216 = vmatprep.mubr.bf16.mxu1 %v3019_v25  ;;  %v860_v33 = vpop.permute.xlu1 %859 }
 0x15c   :  { %v4452_v18 = vpop.permute.xlu0 %924 }
 0x15f   :  { %v4454_v14 = vpop.permute.xlu1 %929 }
 0x160   :  { %v845_v37 = vpop.permute.xlu0 %844 }
 0x162   :  { %1217 = vmatmul.mubr.bf16.gmra.mxu1 %v3021_v11 }
 0x163   :  { %1224 = vmatprep.mubr.bf16.mxu1 %v3022_v61  ;;  %v850_v54 = vpop.permute.xlu1 %849 }
 0x164   :  { %v4456_v20 = vpop.permute.xlu0 %914 }
 0x167   :  { %v4458_v7 = vpop.permute.xlu1 %919 }
 0x168   :  { %v835_v55 = vpop.permute.xlu0 %834 }
 0x16a   :  { %1225 = vmatmul.mubr.bf16.gmra.mxu1 %v3024_v16 }
 0x16b   :  { %1232 = vmatprep.mubr.bf16.mxu1 %v3025_v15  ;;  %v840_v30 = vpop.permute.xlu1 %839 }
 0x172   :  { %1233 = vmatmul.mubr.bf16.gmra.mxu1 %v3027_v63 }
 0x173   :  { %1240 = vmatprep.mubr.bf16.mxu1 %v3028_v22 }
 0x17a   :  { %1241 = vmatmul.mubr.bf16.gmra.mxu1 %v3030_v32 }
 0x17b   :  { %1248 = vmatprep.mubr.bf16.mxu1 %v3031_v53 }
 0x182   :  { %1249 = vmatmul.mubr.bf16.gmra.mxu1 %v3033_v48 }
 0x183   :  { %1256 = vmatprep.mubr.bf16.mxu1 %v3034_v58 }
 0x18a   :  { %1257 = vmatmul.mubr.bf16.gmra.mxu1 %v3036_v17 }
 0x18b   :  { %1264 = vmatprep.mubr.bf16.mxu1 %v3037_v59 }
 0x192   :  { %1265 = vmatmul.mubr.bf16.gmra.mxu1 %v3039_v10 }
 0x193   :  { %1272 = vmatprep.mubr.bf16.mxu1 %v3040_v36 }
 0x19a   :  { %1273 = vmatmul.mubr.bf16.gmra.mxu1 %v3042_v8 }
 0x19b   :  { %1280 = vmatprep.mubr.bf16.mxu1 %v3043_v51 }
 0x1a2   :  { %1281 = vmatmul.mubr.bf16.gmra.mxu1 %v3045_v23 }
 0x1a3   :  { %1288 = vmatprep.mubr.bf16.mxu1 %v3046_v56 }
 0x1aa   :  { %1289 = vmatmul.mubr.bf16.gmra.mxu1 %v3048_v26 }
 0x1ab   :  { %1296 = vmatprep.mubr.bf16.mxu1 %v3049_v49 }
 0x1b2   :  { %1297 = vmatmul.mubr.bf16.gmra.mxu1 %v3051_v52 }
 0x1b3   :  { %1304 = vmatprep.mubr.bf16.mxu1 %v3052_v24 }
 0x1ba   :  { %1305 = vmatmul.mubr.bf16.gmra.mxu1 %v3054_v21 }
 0x202   :  { %v2739_v45 = vpop.f32.mrf.mxu1 }
 0x204   :  { %v2740_v6 = vpop.f32.mrf.mxu1 }
 0x205   :  { %v2741_v44 = vadd.f32 %v2740_v6, %v2739_v45 }
 0x206   :  { %v2742_v35 = vpop.f32.mrf.mxu1 }
 0x207   :  { %v4460_v29 = vadd.f32 %v2741_v44, %v835_v55 }
 0x208   :  { %v2743_v34 = vpop.f32.mrf.mxu1 }
 0x209   :  { %v1313_v27 = vsub.f32 0.0, %v4460_v29  ;;  %v2744_v42 = vadd.f32 %v2743_v34, %v2742_v35 }
 0x20a   :  { %v2745_v25 = vpop.f32.mrf.mxu1 }
 0x20b   :  { %v1345_v11 = vmul.f32 1.442695, %v1313_v27  ;;  %v4463_v61 = vadd.f32 %v2744_v42, %v840_v30 }
 0x20c   :  { %v2746_v16 = vpop.f32.mrf.mxu1 }
 0x20d   :  { %3231 = vpow2.f32 %v1345_v11  ;;  %v1314_v15 = vsub.f32 0.0, %v4463_v61  ;;  %v2747_v63 = vadd.f32 %v2746_v16, %v2745_v25 }
 0x20e   :  { %v2748_v22 = vpop.f32.mrf.mxu1 }
 0x20f   :  { %v1347_v32 = vmul.f32 1.442695, %v1314_v15  ;;  %v4466_v53 = vadd.f32 %v2747_v63, %v845_v37 }
 0x210   :  { %v2749_v48 = vpop.f32.mrf.mxu1 }
 0x211   :  { %3233 = vpow2.f32 %v1347_v32  ;;  %v1315_v58 = vsub.f32 0.0, %v4466_v53  ;;  %v2750_v17 = vadd.f32 %v2749_v48, %v2748_v22 }
 0x212   :  { %v2751_v59 = vpop.f32.mrf.mxu1 }
 0x213   :  { %v1349_v10 = vmul.f32 1.442695, %v1315_v58  ;;  %v4469_v36 = vadd.f32 %v2750_v17, %v850_v54 }
 0x214   :  { %v2752_v8 = vpop.f32.mrf.mxu1 }
 0x215   :  { %3235 = vpow2.f32 %v1349_v10  ;;  %v1316_v51 = vsub.f32 0.0, %v4469_v36  ;;  %v2753_v23 = vadd.f32 %v2752_v8, %v2751_v59 }
 0x216   :  { %v2754_v56 = vpop.f32.mrf.mxu1 }
 0x217   :  { %v1351_v26 = vmul.f32 1.442695, %v1316_v51  ;;  %v4472_v49 = vadd.f32 %v2753_v23, %v855_v5 }
 0x218   :  { %v2755_v52 = vpop.f32.mrf.mxu1 }
 0x219   :  { %3237 = vpow2.f32 %v1351_v26  ;;  %v1317_v24 = vsub.f32 0.0, %v4472_v49  ;;  %v2756_v21 = vadd.f32 %v2755_v52, %v2754_v56 }
 0x21a   :  { %v3232_v37 = vpop.eup %3231  ;;  %v2757_v45 = vpop.f32.mrf.mxu1 }
 0x21b   :  { %v1409_v6 = vadd.f32 1.0, %v3232_v37  ;;  %v1353_v44 = vmul.f32 1.442695, %v1317_v24  ;;  %v4475_v54 = vadd.f32 %v2756_v21, %v860_v33 }
 0x21c   :  { %v2758_v55 = vpop.f32.mrf.mxu1 }
 0x21d   :  { %v1318_v35 = vsub.f32 0.0, %v4475_v54  ;;  %v2759_v34 = vadd.f32 %v2758_v55, %v2757_v45  ;;  %3239 = vpow2.f32 %v1353_v44 }
 0x21e   :  { %v3234_v27 = vpop.eup %3233  ;;  %v2760_v42 = vpop.f32.mrf.mxu1  ;;  %3241 = vrcp.f32 %v1409_v6 }
 0x21f   :  { %v1410_v5 = vadd.f32 1.0, %v3234_v27  ;;  %v1355_v30 = vmul.f32 1.442695, %v1318_v35  ;;  %v4479_v25 = vadd.f32 %v2759_v34, %v4444_v38 }
 0x220   :  { %v2761_v11 = vpop.f32.mrf.mxu1 }
 0x221   :  { %3243 = vrcp.f32 %v1410_v5  ;;  %v1319_v16 = vsub.f32 0.0, %v4479_v25  ;;  %v2762_v15 = vadd.f32 %v2761_v11, %v2760_v42 }
 0x222   :  { %v3236_v33 = vpop.eup %3235  ;;  %3245 = vpow2.f32 %v1355_v30  ;;  %v2763_v63 = vpop.f32.mrf.mxu1 }
 0x223   :  { %v1411_v22 = vadd.f32 1.0, %v3236_v33  ;;  %v1357_v32 = vmul.f32 1.442695, %v1319_v16  ;;  %v4483_v48 = vadd.f32 %v2762_v15, %v4446_v46 }
 0x224   :  { %v2764_v58 = vpop.f32.mrf.mxu1 }
 0x225   :  { %v1320_v17 = vsub.f32 0.0, %v4483_v48  ;;  %v2765_v59 = vadd.f32 %v2764_v58, %v2763_v63  ;;  %3247 = vpow2.f32 %v1357_v32 }
 0x226   :  { %v3238_v10 = vpop.eup %3237  ;;  %v2766_v38 = vpop.f32.mrf.mxu1  ;;  %3249 = vrcp.f32 %v1411_v22 }
 0x227   :  { %v1412_v8 = vadd.f32 1.0, %v3238_v10  ;;  %v1359_v51 = vmul.f32 1.442695, %v1320_v17  ;;  %v4487_v23 = vadd.f32 %v2765_v59, %v4436_v12 }
 0x228   :  { %v2767_v56 = vpop.f32.mrf.mxu1 }
 0x229   :  { %3251 = vrcp.f32 %v1412_v8  ;;  %v1321_v26 = vsub.f32 0.0, %v4487_v23  ;;  %v2768_v52 = vadd.f32 %v2767_v56, %v2766_v38 }
 0x22a   :  { %3253 = vpow2.f32 %v1359_v51  ;;  %v2769_v46 = vpop.f32.mrf.mxu1  ;;  %v3240_v24 = vpop.eup %3239 }
 0x22b   :  { %v1361_v21 = vmul.f32 1.442695, %v1321_v26  ;;  %v4491_v37 = vadd.f32 %v2768_v52, %v4438_v47  ;;  %v3242_v45 = vpop.eup %3241  ;;  %v1413_v6 = vadd.f32 1.0, %v3240_v24 }
 0x22c   :  { %v2770_v44 = vpop.f32.mrf.mxu1  ;;  %v4495_v42 = vmul.f32 %v3242_v45, %v4460_v29 }
 0x22d   :  { %3255 = vpow2.f32 %v1361_v21  ;;  %v1322_v55 = vsub.f32 0.0, %v4491_v37  ;;  %v2771_v12 = vadd.f32 %v2770_v44, %v2769_v46 }
 0x22e   :  { %v3244_v35 = vpop.eup %3243  ;;  %v2772_v34 = vpop.f32.mrf.mxu1  ;;  %3257 = vrcp.f32 %v1413_v6 }
 0x22f   :  { %v3246_v27 = vpop.eup %3245  ;;  %v4498_v5 = vmul.f32 %v3244_v35, %v4463_v61  ;;  %v1363_v30 = vmul.f32 1.442695, %v1322_v55  ;;  %v4501_v47 = vadd.f32 %v2771_v12, %v4428_v41 }
 0x230   :  { %v1414_v11 = vadd.f32 1.0, %v3246_v27  ;;  %v2773_v16 = vpop.f32.mrf.mxu1 }
 0x231   :  { %3259 = vpow2.f32 %v1363_v30  ;;  %v1323_v33 = vsub.f32 0.0, %v4501_v47  ;;  %v2774_v63 = vadd.f32 %v2773_v16, %v2772_v34 }
 0x232   :  { %3261 = vrcp.f32 %v1414_v11  ;;  %v2775_v29 = vpop.f32.mrf.mxu1  ;;  %v3248_v22 = vpop.eup %3247 }
 0x233   :  { %v1365_v32 = vmul.f32 1.442695, %v1323_v33  ;;  %v4507_v61 = vadd.f32 %v2774_v63, %v4430_v1  ;;  %v3250_v58 = vpop.eup %3249  ;;  %v1415_v41 = vadd.f32 1.0, %v3248_v22 }
 0x234   :  { %v2776_v17 = vpop.f32.mrf.mxu1  ;;  %v4511_v56 = vmul.f32 %v3250_v58, %v4466_v53 }
 0x235   :  { %3263 = vpow2.f32 %v1365_v32  ;;  %v1324_v59 = vsub.f32 0.0, %v4507_v61  ;;  %v2777_v10 = vadd.f32 %v2776_v17, %v2775_v29 }
 0x236   :  { %v3252_v38 = vpop.eup %3251  ;;  %v2778_v8 = vpop.f32.mrf.mxu1  ;;  %3265 = vrcp.f32 %v1415_v41 }
 0x237   :  { %v3254_v51 = vpop.eup %3253  ;;  %v4514_v26 = vmul.f32 %v3252_v38, %v4469_v36  ;;  %v1367_v52 = vmul.f32 1.442695, %v1324_v59  ;;  %v4517_v1 = vadd.f32 %v2777_v10, %v4420_v31 }
 0x238   :  { %v1416_v46 = vadd.f32 1.0, %v3254_v51  ;;  %v2779_v24 = vpop.f32.mrf.mxu1 }
 0x239   :  { %3267 = vpow2.f32 %v1367_v52  ;;  %v1325_v45 = vsub.f32 0.0, %v4517_v1  ;;  %v2780_v6 = vadd.f32 %v2779_v24, %v2778_v8 }
 0x23a   :  { %v3256_v44 = vpop.eup %3255  ;;  %3269 = vrcp.f32 %v1416_v46  ;;  %v2781_v53 = vpop.f32.mrf.mxu1 }
 0x23b   :  { %v1417_v55 = vadd.f32 1.0, %v3256_v44  ;;  %v1369_v36 = vmul.f32 1.442695, %v1325_v45  ;;  %v4523_v12 = vadd.f32 %v2780_v6, %v4422_v50  ;;  %v3258_v35 = vpop.eup %3257 }
 0x23c   :  { %v2782_v31 = vpop.f32.mrf.mxu1  ;;  %v4530_v22 = vmul.f32 %v3258_v35, %v4472_v49 }
 0x23d   :  { %v1326_v34 = vsub.f32 0.0, %v4523_v12  ;;  %v2783_v27 = vadd.f32 %v2782_v31, %v2781_v53  ;;  %3271 = vpow2.f32 %v1369_v36 }
 0x23e   :  { %v3260_v30 = vpop.eup %3259  ;;  %v2784_v11 = vpop.f32.mrf.mxu1  ;;  %3273 = vrcp.f32 %v1417_v55 }
 0x23f   :  { %v3262_v16 = vpop.eup %3261  ;;  %v1418_v33 = vadd.f32 1.0, %v3260_v30  ;;  %v1371_v63 = vmul.f32 1.442695, %v1326_v34  ;;  %v4527_v29 = vadd.f32 %v2783_v27, %v4409_v13  ;;  %v3057_v34 = vld [vmem:[%s5130_s6 + $0x4] ss:$8 sps:$4 sm:$0xff]  }
 0x240   :  { %v4533_v50 = vmul.f32 %v3262_v16, %v4475_v54  ;;  %v2785_v32 = vpop.f32.mrf.mxu1  ;;  %1937 = vmatprep.mubr.bf16.mxu0 %v3057_v34 }
 0x241   :  { %3275 = vrcp.f32 %v1418_v33  ;;  %v1327_v58 = vsub.f32 0.0, %v4527_v29  ;;  %v2786_v41 = vadd.f32 %v2785_v32, %v2784_v11 }
 0x242   :  { %v3264_v17 = vpop.eup %3263  ;;  %3277 = vpow2.f32 %v1371_v63  ;;  %v2787_v10 = vpop.f32.mrf.mxu1 }
 0x243   :  { %v1419_v38 = vadd.f32 1.0, %v3264_v17  ;;  %v1373_v13 = vmul.f32 1.442695, %v1327_v58  ;;  %v4539_v8 = vadd.f32 %v2786_v41, %v4411_v62  ;;  %v3266_v51 = vpop.eup %3265 }
 0x244   :  { %v2788_v49 = vpop.f32.mrf.mxu1  ;;  %v4546_v55 = vmul.f32 %v3266_v51, %v4479_v25 }
 0x245   :  { %v1328_v54 = vsub.f32 0.0, %v4539_v8  ;;  %v2789_v52 = vadd.f32 %v2788_v49, %v2787_v10  ;;  %3279 = vpow2.f32 %v1373_v13 }
 0x246   :  { %v3268_v46 = vpop.eup %3267  ;;  %v2790_v24 = vpop.f32.mrf.mxu1  ;;  %3281 = vrcp.f32 %v1419_v38 }
 0x247   :  { %v3270_v45 = vpop.eup %3269  ;;  %v1420_v6 = vadd.f32 1.0, %v3268_v46  ;;  %v1375_v44 = vmul.f32 1.442695, %v1328_v54  ;;  %v4543_v53 = vadd.f32 %v2789_v52, %v4456_v20 }
 0x248   :  { %v4549_v62 = vmul.f32 %v3270_v45, %v4483_v48  ;;  %v2791_v36 = vpop.f32.mrf.mxu1 }
 0x249   :  { %3283 = vrcp.f32 %v1420_v6  ;;  %v1329_v31 = vsub.f32 0.0, %v4543_v53  ;;  %v2792_v35 = vadd.f32 %v2791_v36, %v2790_v24 }
 0x24a   :  { %3285 = vpow2.f32 %v1375_v44  ;;  %v2793_v20 = vpop.f32.mrf.mxu1  ;;  %v3272_v30 = vpop.eup %3271 }
 0x24b   :  { %v1377_v25 = vmul.f32 1.442695, %v1329_v31  ;;  %v4558_v11 = vadd.f32 %v2792_v35, %v4458_v7  ;;  %v3274_v48 = vpop.eup %3273  ;;  %v1421_v16 = vadd.f32 1.0, %v3272_v30 }
 0x24c   :  { %v2794_v33 = vpop.f32.mrf.mxu1  ;;  %v4562_v10 = vmul.f32 %v3274_v48, %v4487_v23 }
 0x24d   :  { %3287 = vpow2.f32 %v1377_v25  ;;  %v1330_v63 = vsub.f32 0.0, %v4558_v11  ;;  %v2795_v32 = vadd.f32 %v2794_v33, %v2793_v20 }
 0x24e   :  { %v3276_v58 = vpop.eup %3275  ;;  %v2796_v41 = vpop.f32.mrf.mxu1  ;;  %3289 = vrcp.f32 %v1421_v16 }
 0x24f   :  { %v3278_v17 = vpop.eup %3277  ;;  %v4565_v38 = vmul.f32 %v3276_v58, %v4491_v37  ;;  %v1379_v13 = vmul.f32 1.442695, %v1330_v63  ;;  %v4568_v7 = vadd.f32 %v2795_v32, %v4452_v18 }
 0x250   :  { %v1422_v49 = vadd.f32 1.0, %v3278_v17  ;;  %v2797_v51 = vpop.f32.mrf.mxu1 }
 0x251   :  { %3291 = vpow2.f32 %v1379_v13  ;;  %v1331_v52 = vsub.f32 0.0, %v4568_v7  ;;  %v2798_v46 = vadd.f32 %v2797_v51, %v2796_v41 }
 0x252   :  { %3293 = vrcp.f32 %v1422_v49  ;;  %v4573_v23 = vpop.f32.mrf.mxu1  ;;  %v3280_v24 = vpop.eup %3279 }
 0x253   :  { %v1381_v37 = vmul.f32 1.442695, %v1331_v52  ;;  %v4576_v45 = vadd.f32 %v2798_v46, %v4454_v14  ;;  %v3282_v18 = vpop.eup %3281  ;;  %v1423_v6 = vadd.f32 1.0, %v3280_v24 }
 0x254   :  { %v4578_v44 = vpop.f32.mrf.mxu1  ;;  %v4584_v20 = vmul.f32 %v3282_v18, %v4501_v47 }
 0x255   :  { %3295 = vpow2.f32 %v1381_v37  ;;  %v1332_v36 = vsub.f32 0.0, %v4576_v45 }
 0x256   :  { %v3284_v31 = vpop.eup %3283  ;;  %v4581_v35 = vpop.f32.mrf.mxu1  ;;  %3297 = vrcp.f32 %v1423_v6 }
 0x257   :  { %v3286_v34 = vpop.eup %3285  ;;  %v4587_v30 = vmul.f32 %v3284_v31, %v4507_v61  ;;  %v1383_v25 = vmul.f32 1.442695, %v1332_v36 }
 0x258   :  { %v1424_v14 = vadd.f32 1.0, %v3286_v34  ;;  %v4589_v48 = vpop.f32.mrf.mxu1 }
 0x259   :  { %3299 = vpow2.f32 %v1383_v25 }
 0x25a   :  { %v3288_v33 = vpop.eup %3287  ;;  %3301 = vrcp.f32 %v1424_v14  ;;  %v4593_v63 = vpop.f32.mrf.mxu1 }
 0x25b   :  { %v1425_v32 = vadd.f32 1.0, %v3288_v33  ;;  %v3290_v47 = vpop.eup %3289 }
 0x25c   :  { %v4595_v58 = vpop.f32.mrf.mxu1  ;;  %v4598_v49 = vmul.f32 %v3290_v47, %v4517_v1 }
 0x25d   :  { %3303 = vrcp.f32 %v1425_v32 }
 0x25e   :  { %v3292_v41 = vpop.eup %3291  ;;  %v2808_v61 = vpop.f32.mrf.mxu1 }
 0x25f   :  { %v3294_v17 = vpop.eup %3293  ;;  %v1426_v13 = vadd.f32 1.0, %v3292_v41 }
 0x260   :  { %v4601_v51 = vmul.f32 %v3294_v17, %v4523_v12  ;;  %v2809_v52 = vpop.f32.mrf.mxu1 }
 0x261   :  { %3305 = vrcp.f32 %v1426_v13 }
 0x262   :  { %v3296_v46 = vpop.eup %3295  ;;  %v2811_v37 = vpop.f32.mrf.mxu1 }
 0x263   :  { %v1427_v18 = vadd.f32 1.0, %v3296_v46  ;;  %v3298_v36 = vpop.eup %3297 }
 0x264   :  { %v2812_v6 = vpop.f32.mrf.mxu1  ;;  %v4606_v1 = vmul.f32 %v3298_v36, %v4527_v29 }
 0x265   :  { %3307 = vrcp.f32 %v1427_v18 }
 0x266   :  { %v3300_v31 = vpop.eup %3299  ;;  %v2814_v34 = vpop.f32.mrf.mxu1 }
 0x267   :  { %v3302_v25 = vpop.eup %3301  ;;  %v1428_v14 = vadd.f32 1.0, %v3300_v31 }
 0x268   :  { %v4609_v12 = vmul.f32 %v3302_v25, %v4539_v8  ;;  %v2815_v33 = vpop.f32.mrf.mxu1 }
 0x269   :  { %3309 = vrcp.f32 %v1428_v14 }
 0x26a   :  { %v1544_v32 = vpack.c.bf16 %v4609_v12, %v4606_v1  ;;  %v2817_v47 = vpop.f32.mrf.mxu1  ;;  %v3304_v41 = vpop.eup %3303 }
 0x26b   :  { %v4614_v15 = vmul.f32 %v3304_v41, %v4543_v53 }
 0x26c   :  { %v2818_v17 = vpop.f32.mrf.mxu1 }
 0x26e   :  { %v3306_v13 = vpop.eup %3305  ;;  %v2820_v46 = vpop.f32.mrf.mxu1 }
 0x26f   :  { %v4617_v18 = vmul.f32 %v3306_v13, %v4558_v11  ;;  %v2819_v11 = vadd.f32 %v2818_v17, %v2817_v47  ;;  %v2813_v17 = vadd.f32 %v2812_v6, %v2811_v37 }
 0x270   :  { %v2821_v29 = vpop.f32.mrf.mxu1 }
 0x271   :  { %v2822_v53 = vadd.f32 %v2821_v29, %v2820_v46  ;;  %v4655_v37 = vadd.f32 %v2813_v17, %v4432_v2  ;;  %v2801_v2 = vadd.f32 %v4578_v44, %v4573_v23 }
 0x272   :  { %v2823_v36 = vpop.f32.mrf.mxu1  ;;  %v3308_v31 = vpop.eup %3307 }
 0x273   :  { %v4622_v27 = vmul.f32 %v3308_v31, %v4568_v7  ;;  %v4636_v7 = vadd.f32 %v2822_v53, %v4426_v0 }
 0x274   :  { %v2824_v25 = vpop.f32.mrf.mxu1 }
 0x275   :  { %v2825_v14 = vadd.f32 %v2824_v25, %v2823_v36  ;;  %v2816_v25 = vadd.f32 %v2815_v33, %v2814_v34  ;;  %v1340_v0 = vsub.f32 0.0, %v4636_v7 }
 0x276   :  { %v3310_v21 = vpop.eup %3309  ;;  %v2826_v59 = vpop.f32.mrf.mxu1 }
 0x277   :  { %v4625_v54 = vmul.f32 %v3310_v21, %v4576_v45  ;;  %v4628_v13 = vadd.f32 %v2825_v14, %v4416_v40  ;;  %v4639_v45 = vadd.f32 %v2819_v11, %v4424_v57 }
 0x278   :  { %v2827_v41 = vpop.f32.mrf.mxu1 }
 0x279   :  { %v2828_v16 = vadd.f32 %v2827_v41, %v2826_v59  ;;  %v1546_v8 = vpack.c.bf16 %v4625_v54, %v4622_v27  ;;  %v1341_v47 = vsub.f32 0.0, %v4628_v13  ;;  %v1339_v57 = vsub.f32 0.0, %v4639_v45  ;;  %v3069_v27 = vld [vmem:[%s5130_s6 + $0x40] ss:$8 sps:$4 sm:$0xff]   ;;  %v3070_v54 = vld [vmem:[%s5130_s6 + $0x54] ss:$8 sps:$4 sm:$0xff]  }
 0x27a   :  { %v2829_v24 = vpop.f32.mrf.mxu1  ;;  %v1399_v41 = vmul.f32 1.442695, %v1340_v0 }
 0x27b   :  { %v4633_v36 = vadd.f32 %v2828_v16, %v4418_v60  ;;  %v2810_v60 = vadd.f32 %v2809_v52, %v2808_v61  ;;  %v4647_v16 = vadd.f32 %v2816_v25, %v4434_v9  ;;  %v1401_v33 = vmul.f32 1.442695, %v1341_v47 }
 0x27c   :  { %v2830_v21 = vpop.f32.mrf.mxu1  ;;  %v2804_v61 = vadd.f32 %v4589_v48, %v4581_v35  ;;  %v1397_v11 = vmul.f32 1.442695, %v1339_v57 }
 0x27d   :  { %v1342_v40 = vsub.f32 0.0, %v4633_v36  ;;  %v2831_v59 = vadd.f32 %v2830_v21, %v2829_v24  ;;  %v2807_v24 = vadd.f32 %v4595_v58, %v4593_v63  ;;  %v4663_v52 = vadd.f32 %v2810_v60, %v4442_v28 }
 0x27e   :  { %v2832_v46 = vpop.f32.mrf.mxu1  ;;  %v1338_v6 = vsub.f32 0.0, %v4647_v16  ;;  %v4674_v28 = vadd.f32 %v2804_v61, %v4450_v19  ;;  %v4678_v21 = vadd.f32 %v2801_v2, %v4448_v3 }
 0x27f   :  { %v1403_v29 = vmul.f32 1.442695, %v1342_v40  ;;  %v4644_v31 = vadd.f32 %v2831_v59, %v4399_v43  ;;  %v4670_v58 = vadd.f32 %v2807_v24, %v4440_v4  ;;  %v1336_v48 = vsub.f32 0.0, %v4663_v52 }
 0x280   :  { %v2833_v34 = vpop.f32.mrf.mxu1  ;;  %v1395_v25 = vmul.f32 1.442695, %v1338_v6  ;;  %v1334_v4 = vsub.f32 0.0, %v4674_v28  ;;  %v1333_v40 = vsub.f32 0.0, %v4678_v21 }
 0x281   :  { %v1343_v14 = vsub.f32 0.0, %v4644_v31  ;;  %v2834_v53 = vadd.f32 %v2833_v34, %v2832_v46  ;;  %3311 = vpow2.f32 %v1403_v29  ;;  %v1335_v23 = vsub.f32 0.0, %v4670_v58 }
 0x282   :  { %3313 = vpow2.f32 %v1401_v33  ;;  %v1391_v47 = vmul.f32 1.442695, %v1336_v48  ;;  %v1387_v17 = vmul.f32 1.442695, %v1334_v4  ;;  %v1385_v29 = vmul.f32 1.442695, %v1333_v40 }
 0x283   :  { %v1405_v43 = vmul.f32 1.442695, %v1343_v14  ;;  %v4658_v9 = vadd.f32 %v2834_v53, %v4407_v39  ;;  %v1337_v39 = vsub.f32 0.0, %v4655_v37  ;;  %v1389_v19 = vmul.f32 1.442695, %v1335_v23 }
 0x285   :  { %v1344_v63 = vsub.f32 0.0, %v4658_v9  ;;  %3315 = vpow2.f32 %v1405_v43  ;;  %v1393_v44 = vmul.f32 1.442695, %v1337_v39 }
 0x286   :  { %3317 = vpow2.f32 %v1399_v41 }
 0x287   :  { %v1407_v35 = vmul.f32 1.442695, %v1344_v63  ;;  %3319 = vpow2.f32 %v1397_v11 }
 0x289   :  { %3321 = vpow2.f32 %v1407_v35 }
 0x28a   :  { %3323 = vpow2.f32 %v1395_v25 }
 0x28b   :  { %3325 = vpow2.f32 %v1393_v44 }
 0x28c   :  { %3327 = vpow2.f32 %v1391_v47 }
 0x28d   :  { %3329 = vpow2.f32 %v1389_v19 }
 0x28e   :  { %v3312_v59 = vpop.eup %3311  ;;  %3331 = vpow2.f32 %v1387_v17 }
 0x28f   :  { %v3314_v46 = vpop.eup %3313  ;;  %v1438_v60 = vadd.f32 1.0, %v3312_v59  ;;  %3333 = vpow2.f32 %v1385_v29 }
 0x290   :  { %v1437_v57 = vadd.f32 1.0, %v3314_v46 }
 0x291   :  { %3335 = vrcp.f32 %v1438_v60 }
 0x292   :  { %v3316_v3 = vpop.eup %3315 }
 0x293   :  { %v1439_v0 = vadd.f32 1.0, %v3316_v3  ;;  %v3318_v34 = vpop.eup %3317 }
 0x294   :  { %v3320_v33 = vpop.eup %3319  ;;  %v1436_v53 = vadd.f32 1.0, %v3318_v34 }
 0x295   :  { %3337 = vrcp.f32 %v1439_v0  ;;  %v1435_v61 = vadd.f32 1.0, %v3320_v33 }
 0x296   :  { %v3322_v14 = vpop.eup %3321  ;;  %3339 = vrcp.f32 %v1437_v57 }
 0x297   :  { %v1440_v24 = vadd.f32 1.0, %v3322_v14  ;;  %v3324_v43 = vpop.eup %3323 }
 0x298   :  { %v3326_v6 = vpop.eup %3325  ;;  %v1434_v41 = vadd.f32 1.0, %v3324_v43 }
 0x299   :  { %3341 = vrcp.f32 %v1440_v24  ;;  %v3328_v11 = vpop.eup %3327  ;;  %v1433_v63 = vadd.f32 1.0, %v3326_v6  ;;  %v5147_v6 = vpack.c.bf16 %v4549_v62, %v4546_v55  ;;  %v3055_v55 = vld [vmem:[%s5130_s6] ss:$8 sps:$4 sm:$0xff]   ;;  %v3067_v62 = vld [vmem:[%s5130_s6 + $0x44] ss:$8 sps:$4 sm:$0xff]  }
 0x29a   :  { %3343 = vrcp.f32 %v1436_v53  ;;  %v3330_v2 = vpop.eup %3329  ;;  %v1432_v39 = vadd.f32 1.0, %v3328_v11  ;;  %v3082_v11 = vld [vmem:[%s5130_s6 + $0x94] ss:$8 sps:$4 sm:$0xff]  }
 0x29b   :  { %3345 = vrcp.f32 %v1435_v61  ;;  %v3332_v35 = vpop.eup %3331  ;;  %v1431_v48 = vadd.f32 1.0, %v3330_v2  ;;  %v3085_v2 = vld [vmem:[%s5130_s6 + $0xa4] ss:$8 sps:$4 sm:$0xff]  }
 0x29c   :  { %3347 = vrcp.f32 %v1434_v41  ;;  %v3334_v25 = vpop.eup %3333  ;;  %v1430_v44 = vadd.f32 1.0, %v3332_v35  ;;  %v3081_v41 = vld [vmem:[%s5130_s6 + $0x80] ss:$8 sps:$4 sm:$0xff]   ;;  %v3088_v35 = vld [vmem:[%s5130_s6 + $0xb4] ss:$8 sps:$4 sm:$0xff]  }
 0x29d   :  { %3349 = vrcp.f32 %v1433_v63  ;;  %v1429_v40 = vadd.f32 1.0, %v3334_v25  ;;  %v3084_v63 = vld [vmem:[%s5130_s6 + $0x90] ss:$8 sps:$4 sm:$0xff]   ;;  %v3091_v25 = vld [vmem:[%s5130_s6 + $0xc4] ss:$8 sps:$4 sm:$0xff]  }
 0x29e   :  { %v3336_v23 = vpop.eup %3335  ;;  %3351 = vrcp.f32 %v1432_v39  ;;  %v3087_v39 = vld [vmem:[%s5130_s6 + $0xa0] ss:$8 sps:$4 sm:$0xff]  }
 0x29f   :  { %3353 = vrcp.f32 %v1431_v48  ;;  %v1502_v59 = vmul.f32 %v3336_v23, %v4633_v36  ;;  %v3090_v48 = vld [vmem:[%s5130_s6 + $0xb0] ss:$8 sps:$4 sm:$0xff]   ;;  %v3093_v23 = vld [vmem:[%s5130_s6 + $0xc0] ss:$8 sps:$4 sm:$0xff]  }
 0x2a0   :  { %3355 = vrcp.f32 %v1430_v44  ;;  %v3094_v44 = vld [vmem:[%s5130_s6 + $0xd4] ss:$8 sps:$4 sm:$0xff]  }
 0x2a1   :  { %3357 = vrcp.f32 %v1429_v40  ;;  %v3099_v40 = vld [vmem:[%s5130_s6 + $0xe0] ss:$8 sps:$4 sm:$0xff]  }
 0x2a2   :  { %v3338_v4 = vpop.eup %3337 }
 0x2a3   :  { %v3340_v47 = vpop.eup %3339  ;;  %v1503_v17 = vmul.f32 %v3338_v4, %v4644_v31  ;;  %v3096_v4 = vld [vmem:[%s5130_s6 + $0xd0] ss:$8 sps:$4 sm:$0xff]  }
 0x2a4   :  { %v1501_v3 = vmul.f32 %v3340_v47, %v4628_v13  ;;  %v5144_v13 = vpack.c.bf16 %v4601_v51, %v4598_v49  ;;  %v5146_v51 = vpack.c.bf16 %v4565_v38, %v4562_v10  ;;  %v5149_v10 = vpack.c.bf16 %v4514_v26, %v4511_v56  ;;  %v3060_v56 = vld [vmem:[%s5130_s6 + $0x10] ss:$8 sps:$4 sm:$0xff]   ;;  %v3097_v47 = vld [vmem:[%s5130_s6 + $0xe4] ss:$8 sps:$4 sm:$0xff]  }
 0x2a5   :  { %v5150_v38 = vpack.c.bf16 %v4617_v18, %v4614_v15  ;;  %v3061_v15 = vld [vmem:[%s5130_s6 + $0x24] ss:$8 sps:$4 sm:$0xff]   ;;  %v3066_v26 = vld [vmem:[%s5130_s6 + $0x30] ss:$8 sps:$4 sm:$0xff]  }
 0x2a6   :  { %v3342_v19 = vpop.eup %3341  ;;  %v1551_v57 = vpack.c.bf16 %v1502_v59, %v1501_v3  ;;  %v3073_v18 = vld [vmem:[%s5130_s6 + $0x64] ss:$8 sps:$4 sm:$0xff]   ;;  %v3102_v59 = vld [vmem:[%s5130_s6 + $0xf0] ss:$8 sps:$4 sm:$0xff]  }
 0x2a7   :  { %v1504_v46 = vmul.f32 %v3342_v19, %v4658_v9  ;;  %v3344_v29 = vpop.eup %3343  ;;  %v3100_v19 = vld [vmem:[%s5130_s6 + $0xf4] ss:$8 sps:$4 sm:$0xff]  }
 0x2a8   :  { %v3346_v0 = vpop.eup %3345  ;;  %v1500_v34 = vmul.f32 %v3344_v29, %v4636_v7 }
 0x2a9   :  { %v1552_v60 = vpack.c.bf16 %v1504_v46, %v1503_v17  ;;  %v3348_v33 = vpop.eup %3347  ;;  %v1499_v36 = vmul.f32 %v3346_v0, %v4639_v45  ;;  %v1588_v17 = vpop.permute.xlu0 %1587 }
 0x2aa   :  { %v3350_v31 = vpop.eup %3349  ;;  %v1498_v9 = vmul.f32 %v3348_v33, %v4647_v16  ;;  %v1593_v46 = vpop.permute.xlu1 %1592 }
 0x2ab   :  { %2835 = vmatprep.subr.bf16.mxu0 %v1552_v60  ;;  %v1550_v14 = vpack.c.bf16 %v1500_v34, %v1499_v36  ;;  %v3352_v53 = vpop.eup %3351  ;;  %v1497_v7 = vmul.f32 %v3350_v31, %v4655_v37 }
 0x2ac   :  { %2836 = vmatpush3.bf16.msra.mxu0 %v1544_v32  ;;  %v3354_v24 = vpop.eup %3353  ;;  %v1496_v43 = vmul.f32 %v3352_v53, %v4663_v52  ;;  %v5145_v32 = vpack.c.bf16 %v4587_v30, %v4584_v20  ;;  %v5148_v20 = vpack.c.bf16 %v4533_v50, %v4530_v22  ;;  %v5151_v22 = vpack.c.bf16 %v4498_v5, %v4495_v42  ;;  %v3058_v50 = vld [vmem:[%s5130_s6 + $0x14] ss:$8 sps:$4 sm:$0xff]   ;;  %v3063_v42 = vld [vmem:[%s5130_s6 + $0x20] ss:$8 sps:$4 sm:$0xff]   ;;  %v3072_v30 = vld [vmem:[%s5130_s6 + $0x50] ss:$8 sps:$4 sm:$0xff]  }
 0x2ad   :  { %2837 = vmatprep.subr.bf16.mxu0 %v1551_v57  ;;  %v1549_v1 = vpack.c.bf16 %v1498_v9, %v1497_v7  ;;  %v3356_v12 = vpop.eup %3355  ;;  %v1495_v45 = vmul.f32 %v3354_v24, %v4670_v58  ;;  %v3064_v5 = vld [vmem:[%s5130_s6 + $0x34] ss:$8 sps:$4 sm:$0xff]   ;;  %v1598_v29 = vpop.permute.xlu0 %1597 }
 0x2ae   :  { %v3358_v16 = vpop.eup %3357  ;;  %v1494_v61 = vmul.f32 %v3356_v12, %v4674_v28  ;;  %v3076_v58 = vld [vmem:[%s5130_s6 + $0x74] ss:$8 sps:$4 sm:$0xff]   ;;  %v3078_v28 = vld [vmem:[%s5130_s6 + $0x70] ss:$8 sps:$4 sm:$0xff]   ;;  %v1603_v3 = vpop.permute.xlu1 %1602 }
 0x2af   :  { %v1548_v49 = vpack.c.bf16 %v1496_v43, %v1495_v45  ;;  %v1493_v37 = vmul.f32 %v3358_v16, %v4678_v21  ;;  %v3079_v21 = vld [vmem:[%s5130_s6 + $0x84] ss:$8 sps:$4 sm:$0xff]  }
 0x2b0   :  { %2838 = vmatpush3.bf16.msra.mxu0 %v5144_v13 }
 0x2b1   :  { %2839 = vmatprep.subr.bf16.mxu0 %v1550_v14  ;;  %v1547_v52 = vpack.c.bf16 %v1494_v61, %v1493_v37  ;;  %v4818_v60 = vpop.permute.xlu0 %1607 }
 0x2b2   :  { %v4820_v0 = vpop.permute.xlu1 %1612 }
 0x2b4   :  { %2840 = vmatpush3.bf16.msra.mxu0 %v5145_v32 }
 0x2b5   :  { %2841 = vmatprep.subr.bf16.mxu0 %v1549_v1  ;;  %v4822_v34 = vpop.permute.xlu0 %1617 }
 0x2b6   :  { %v4824_v57 = vpop.permute.xlu1 %1622 }
 0x2b8   :  { %2842 = vmatpush3.bf16.msra.mxu0 %v5146_v51 }
 0x2b9   :  { %2843 = vmatprep.subr.bf16.mxu0 %v1548_v49  ;;  %v4826_v33 = vpop.permute.xlu0 %1627 }
 0x2ba   :  { %v4828_v9 = vpop.permute.xlu1 %1632 }
 0x2bc   :  { %2844 = vmatpush3.bf16.msra.mxu0 %v5147_v6 }
 0x2bd   :  { %2845 = vmatprep.subr.bf16.mxu0 %v1547_v52  ;;  %v4830_v13 = vpop.permute.xlu0 %1637 }
 0x2be   :  { %v4832_v43 = vpop.permute.xlu1 %1642 }
 0x2c0   :  { %2846 = vmatpush3.bf16.msra.mxu0 %v5148_v20 }
 0x2c1   :  { %2847 = vmatprep.subr.bf16.mxu0 %v1546_v8  ;;  %v3075_v8 = vld [vmem:[%s5130_s6 + $0x60] ss:$8 sps:$4 sm:$0xff]   ;;  %v4834_v12 = vpop.permute.xlu0 %1647 }
 0x2c2   :  { %v4836_v16 = vpop.permute.xlu1 %1652 }
 0x2c4   :  { %2848 = vmatpush3.bf16.msra.mxu0 %v5149_v10 }
 0x2c5   :  { %2849 = vmatprep.subr.bf16.mxu0 %v5150_v38  ;;  %v4838_v49 = vpop.permute.xlu0 %1657 }
 0x2c6   :  { %v4840_v52 = vpop.permute.xlu1 %1662 }
 0x2c8   :  { %2850 = vmatpush3.bf16.msra.mxu0 %v5151_v22 }
 0x2c9   :  { %v4842_v20 = vpop.permute.xlu0 %1667 }
 0x2cb   :  { %1938 = vmatmul.mubr.bf16.vlgmr.msra.gmra.mxu0 %v3055_v55  ;;  %v4844_v55 = vpop.permute.xlu1 %1672 }
 0x2cc   :  { %1945 = vmatprep.mubr.bf16.mxu0 %v3058_v50 }
 0x2cd   :  { %v4846_v50 = vpop.permute.xlu0 %1677 }
 0x2d3   :  { %1946 = vmatmul.mubr.bf16.gmra.mxu0 %v3060_v56 }
 0x2d4   :  { %1953 = vmatprep.mubr.bf16.mxu0 %v3061_v15 }
 0x2db   :  { %1954 = vmatmul.mubr.bf16.gmra.mxu0 %v3063_v42  ;;  %v4848_v42 = vpop.permute.xlu1 %1682 }
 0x2dc   :  { %1961 = vmatprep.mubr.bf16.mxu0 %v3064_v5 }
 0x2e3   :  { %1962 = vmatmul.mubr.bf16.gmra.mxu0 %v3066_v26 }
 0x2e4   :  { %1969 = vmatprep.mubr.bf16.mxu0 %v3067_v62  ;;  %v4850_v62 = vpop.permute.xlu0 %1687 }
 0x2eb   :  { %1970 = vmatmul.mubr.bf16.gmra.mxu0 %v3069_v27 }
 0x2ec   :  { %1977 = vmatprep.mubr.bf16.mxu0 %v3070_v54 }
 0x2f3   :  { %1978 = vmatmul.mubr.bf16.gmra.mxu0 %v3072_v30 }
 0x2f4   :  { %1985 = vmatprep.mubr.bf16.mxu0 %v3073_v18  ;;  %v4854_v18 = vpop.permute.xlu1 %1692 }
 0x2fb   :  { %1986 = vmatmul.mubr.bf16.gmra.mxu0 %v3075_v8 }
 0x2fc   :  { %1993 = vmatprep.mubr.bf16.mxu0 %v3076_v58 }
 0x303   :  { %1994 = vmatmul.mubr.bf16.gmra.mxu0 %v3078_v28  ;;  %v4856_v28 = vpop.permute.xlu0 %1697 }
 0x304   :  { %2001 = vmatprep.mubr.bf16.mxu0 %v3079_v21 }
 0x30b   :  { %2002 = vmatmul.mubr.bf16.gmra.mxu0 %v3081_v41 }
 0x30c   :  { %2009 = vmatprep.mubr.bf16.mxu0 %v3082_v11 }
 0x313   :  { %2010 = vmatmul.mubr.bf16.gmra.mxu0 %v3084_v63 }
 0x314   :  { %2017 = vmatprep.mubr.bf16.mxu0 %v3085_v2 }
 0x31b   :  { %2018 = vmatmul.mubr.bf16.gmra.mxu0 %v3087_v39  ;;  %v4863_v39 = vpop.permute.xlu1 %1702 }
 0x31c   :  { %2025 = vmatprep.mubr.bf16.mxu0 %v3088_v35 }
 0x323   :  { %2026 = vmatmul.mubr.bf16.gmra.mxu0 %v3090_v48 }
 0x324   :  { %2033 = vmatprep.mubr.bf16.mxu0 %v3091_v25 }
 0x32b   :  { %2034 = vmatmul.mubr.bf16.gmra.mxu0 %v3093_v23 }
 0x32c   :  { %2041 = vmatprep.mubr.bf16.mxu0 %v3094_v44  ;;  %v4866_v44 = vpop.permute.xlu0 %1707 }
 0x333   :  { %2042 = vmatmul.mubr.bf16.gmra.mxu0 %v3096_v4 }
 0x334   :  { %2049 = vmatprep.mubr.bf16.mxu0 %v3097_v47 }
 0x33b   :  { %2050 = vmatmul.mubr.bf16.gmra.mxu0 %v3099_v40 }
 0x33c   :  { %2057 = vmatprep.mubr.bf16.mxu0 %v3100_v19 }
 0x343   :  { %2058 = vmatmul.mubr.bf16.gmra.mxu0 %v3102_v59 }
 0x38b   :  { %v2851_v36 = vpop.f32.mrf.mxu0 }
 0x38d   :  { %v2852_v31 = vpop.f32.mrf.mxu0 }
 0x38e   :  { %v2853_v14 = vadd.f32 %v2852_v31, %v2851_v36 }
 0x38f   :  { %v2854_v53 = vpop.f32.mrf.mxu0 }
 0x390   :  { %v4859_v11 = vadd.f32 %v2853_v14, %v1588_v17 }
 0x391   :  { %v2855_v7 = vpop.f32.mrf.mxu0 }
 0x392   :  { %v2856_v5 = vadd.f32 %v2855_v7, %v2854_v53  ;;  %v2066_v23 = vsub.f32 0.0, %v4859_v11  ;;  %v4876_v7 = vpop.permute.xlu0 %1717 }
 0x393   :  { %v2857_v24 = vpop.f32.mrf.mxu0 }
 0x394   :  { %v4852_v54 = vadd.f32 %v2856_v5, %v1593_v46  ;;  %v4871_v46 = vpop.permute.xlu1 %1712 }
 0x395   :  { %v2858_v1 = vpop.f32.mrf.mxu0 }
 0x396   :  { %v2859_v8 = vadd.f32 %v2858_v1, %v2857_v24  ;;  %v2067_v21 = vsub.f32 0.0, %v4852_v54 }
 0x397   :  { %v2860_v32 = vpop.f32.mrf.mxu0 }
 0x398   :  { %v4861_v63 = vadd.f32 %v2859_v8, %v1598_v29  ;;  %v2100_v35 = vmul.f32 1.442695, %v2067_v21  ;;  %v2098_v29 = vmul.f32 1.442695, %v2066_v23  ;;  %v4893_v8 = vpop.permute.xlu0 %1727 }
 0x399   :  { %v2861_v45 = vpop.f32.mrf.mxu0 }
 0x39a   :  { %v2862_v48 = vadd.f32 %v2861_v45, %v2860_v32  ;;  %v2068_v4 = vsub.f32 0.0, %v4861_v63  ;;  %3359 = vpow2.f32 %v2100_v35 }
 0x39b   :  { %v2863_v61 = vpop.f32.mrf.mxu0  ;;  %3361 = vpow2.f32 %v2098_v29 }
 0x39c   :  { %v4869_v19 = vadd.f32 %v2862_v48, %v1603_v3  ;;  %v2102_v31 = vmul.f32 1.442695, %v2068_v4  ;;  %v4905_v29 = vpop.permute.xlu0 %2297 }
 0x39d   :  { %v2864_v51 = vpop.f32.mrf.mxu0 }
 0x39e   :  { %v2865_v47 = vadd.f32 %v2864_v51, %v2863_v61  ;;  %v2069_v24 = vsub.f32 0.0, %v4869_v19  ;;  %3363 = vpow2.f32 %v2102_v31 }
 0x39f   :  { %v2866_v37 = vpop.f32.mrf.mxu0 }
 0x3a0   :  { %v4874_v14 = vadd.f32 %v2865_v47, %v4818_v60 }
 0x3a1   :  { %v2867_v6 = vpop.f32.mrf.mxu0 }
 0x3a2   :  { %v2868_v59 = vadd.f32 %v2867_v6, %v2866_v37  ;;  %v2070_v61 = vsub.f32 0.0, %v4874_v14  ;;  %v4886_v37 = vpop.permute.xlu1 %1722  ;;  %v2104_v6 = vmul.f32 1.442695, %v2069_v24 }
 0x3a3   :  { %v2869_v10 = vpop.f32.mrf.mxu0 }
 0x3a4   :  { %v4880_v1 = vadd.f32 %v2868_v59, %v4820_v0  ;;  %3365 = vpow2.f32 %v2104_v6 }
 0x3a5   :  { %v2870_v38 = vpop.f32.mrf.mxu0 }
 0x3a6   :  { %v2871_v36 = vadd.f32 %v2870_v38, %v2869_v10  ;;  %v2071_v10 = vsub.f32 0.0, %v4880_v1  ;;  %v4898_v48 = vpop.permute.xlu1 %2292 }
 0x3a7   :  { %v2872_v22 = vpop.f32.mrf.mxu0  ;;  %v3360_v35 = vpop.eup %3359 }
 0x3a8   :  { %v4883_v32 = vadd.f32 %v2871_v36, %v4822_v34  ;;  %v2106_v34 = vmul.f32 1.442695, %v2070_v61  ;;  %v3362_v24 = vpop.eup %3361 }
 0x3a9   :  { %v2873_v56 = vpop.f32.mrf.mxu0 }
 0x3aa   :  { %v2874_v45 = vadd.f32 %v2873_v56, %v2872_v22  ;;  %v2072_v0 = vsub.f32 0.0, %v4883_v32  ;;  %3367 = vpow2.f32 %v2106_v34  ;;  %v4907_v6 = vpop.permute.xlu1 %2302 }
 0x3ab   :  { %v2875_v15 = vpop.f32.mrf.mxu0 }
 0x3ac   :  { %v4891_v5 = vadd.f32 %v2874_v45, %v4824_v57  ;;  %v2110_v23 = vmul.f32 1.442695, %v2072_v0  ;;  %v2162_v0 = vadd.f32 1.0, %v3362_v24 }
 0x3ad   :  { %v2876_v26 = vpop.f32.mrf.mxu0 }
 0x3ae   :  { %v2877_v51 = vadd.f32 %v2876_v26, %v2875_v15  ;;  %v2108_v26 = vmul.f32 1.442695, %v2071_v10  ;;  %v2073_v4 = vsub.f32 0.0, %v4891_v5 }
 0x3af   :  { %v2878_v27 = vpop.f32.mrf.mxu0 }
 0x3b0   :  { %v4896_v22 = vadd.f32 %v2877_v51, %v4826_v33  ;;  %3369 = vpow2.f32 %v2108_v26  ;;  %v2112_v36 = vmul.f32 1.442695, %v2073_v4  ;;  %v3364_v51 = vpop.eup %3363 }
 0x3b1   :  { %v2879_v30 = vpop.f32.mrf.mxu0  ;;  %3371 = vpow2.f32 %v2110_v23  ;;  %v3366_v4 = vpop.eup %3365 }
 0x3b2   :  { %v2880_v15 = vadd.f32 %v2879_v30, %v2878_v27  ;;  %v2074_v57 = vsub.f32 0.0, %v4896_v22  ;;  %v2163_v27 = vadd.f32 1.0, %v3360_v35 }
 0x3b3   :  { %v2881_v58 = vpop.f32.mrf.mxu0 }
 0x3b4   :  { %v4903_v59 = vadd.f32 %v2880_v15, %v4828_v9  ;;  %v2114_v45 = vmul.f32 1.442695, %v2074_v57  ;;  %3373 = vrcp.f32 %v2163_v27  ;;  %v4922_v57 = vpop.permute.xlu1 %2312 }
 0x3b5   :  { %v2882_v41 = vpop.f32.mrf.mxu0  ;;  %3375 = vpow2.f32 %v2112_v36 }
 0x3b6   :  { %v2883_v33 = vadd.f32 %v2882_v41, %v2881_v58  ;;  %v2075_v10 = vsub.f32 0.0, %v4903_v59  ;;  %3377 = vpow2.f32 %v2114_v45 }
 0x3b7   :  { %v2884_v2 = vpop.f32.mrf.mxu0  ;;  %3379 = vrcp.f32 %v2162_v0 }
 0x3b8   :  { %v4911_v9 = vadd.f32 %v2883_v33, %v4830_v13  ;;  %v2116_v35 = vmul.f32 1.442695, %v2075_v10 }
 0x3b9   :  { %v2885_v25 = vpop.f32.mrf.mxu0 }
 0x3ba   :  { %v2886_v31 = vadd.f32 %v2885_v25, %v2884_v2  ;;  %v4916_v2 = vpop.permute.xlu0 %2307  ;;  %v2164_v25 = vadd.f32 1.0, %v3364_v51  ;;  %v2076_v23 = vsub.f32 0.0, %v4911_v9 }
 0x3bb   :  { %v2887_v40 = vpop.f32.mrf.mxu0 }
 0x3bc   :  { %v4914_v34 = vadd.f32 %v2886_v31, %v4832_v43  ;;  %3381 = vrcp.f32 %v2164_v25  ;;  %v2118_v36 = vmul.f32 1.442695, %v2076_v23  ;;  %v2165_v31 = vadd.f32 1.0, %v3366_v4 }
 0x3bd   :  { %v2888_v17 = vpop.f32.mrf.mxu0  ;;  %3383 = vpow2.f32 %v2116_v35 }
 0x3be   :  { %v2889_v58 = vadd.f32 %v2888_v17, %v2887_v40  ;;  %v2077_v43 = vsub.f32 0.0, %v4914_v34  ;;  %3385 = vpow2.f32 %v2118_v36 }
 0x3bf   :  { %v2890_v53 = vpop.f32.mrf.mxu0  ;;  %3387 = vrcp.f32 %v2165_v31 }
 0x3c0   :  { %v4920_v13 = vadd.f32 %v2889_v58, %v4834_v12 }
 0x3c1   :  { %v2891_v3 = vpop.f32.mrf.mxu0 }
 0x3c2   :  { %v2892_v15 = vadd.f32 %v2891_v3, %v2890_v53  ;;  %v3368_v3 = vpop.eup %3367  ;;  %v2078_v12 = vsub.f32 0.0, %v4920_v13 }
 0x3c3   :  { %v2893_v60 = vpop.f32.mrf.mxu0  ;;  %v3370_v51 = vpop.eup %3369  ;;  %v2166_v58 = vadd.f32 1.0, %v3368_v3 }
 0x3c4   :  { %v4926_v27 = vadd.f32 %v2892_v15, %v4836_v16  ;;  %v3372_v10 = vpop.eup %3371  ;;  %v4938_v15 = vpop.permute.xlu1 %2322 }
 0x3c5   :  { %v2894_v38 = vpop.f32.mrf.mxu0 }
 0x3c6   :  { %v2895_v40 = vadd.f32 %v2894_v38, %v2893_v60  ;;  %v4932_v38 = vpop.permute.xlu0 %2317  ;;  %v2079_v0 = vsub.f32 0.0, %v4926_v27 }
 0x3c7   :  { %v2896_v56 = vpop.f32.mrf.mxu0 }
 0x3c8   :  { %v4930_v60 = vadd.f32 %v2895_v40, %v4838_v49  ;;  %v2122_v49 = vmul.f32 1.442695, %v2078_v12  ;;  %v3374_v40 = vpop.eup %3373  ;;  %v2124_v3 = vmul.f32 1.442695, %v2079_v0 }
 0x3c9   :  { %v2897_v21 = vpop.f32.mrf.mxu0 }
 0x3ca   :  { %v2898_v33 = vadd.f32 %v2897_v21, %v2896_v56  ;;  %v2120_v56 = vmul.f32 1.442695, %v2077_v43  ;;  %v2080_v35 = vsub.f32 0.0, %v4930_v60  ;;  %v3376_v43 = vpop.eup %3375 }
 0x3cb   :  { %v2899_v47 = vpop.f32.mrf.mxu0  ;;  %v3378_v31 = vpop.eup %3377 }
 0x3cc   :  { %v4935_v21 = vadd.f32 %v2898_v33, %v4840_v52  ;;  %3389 = vpow2.f32 %v2120_v56  ;;  %v4948_v33 = vpop.permute.xlu0 %2327 }
 0x3cd   :  { %v2900_v30 = vpop.f32.mrf.mxu0  ;;  %3391 = vrcp.f32 %v2166_v58 }
 0x3ce   :  { %v2901_v24 = vadd.f32 %v2900_v30, %v2899_v47  ;;  %v2167_v47 = vadd.f32 1.0, %v3370_v51  ;;  %3393 = vpow2.f32 %v2122_v49 }
 0x3cf   :  { %v2902_v61 = vpop.f32.mrf.mxu0 }
 0x3d0   :  { %v4942_v30 = vadd.f32 %v2901_v24, %v4842_v20  ;;  %v2126_v20 = vmul.f32 1.442695, %v2080_v35  ;;  %3395 = vrcp.f32 %v2167_v47  ;;  %v2170_v35 = vadd.f32 1.0, %v3378_v31  ;;  %v4961_v47 = vpop.permute.xlu0 %2337 }
 0x3d1   :  { %v2903_v41 = vpop.f32.mrf.mxu0 }
 0x3d2   :  { %v2904_v16 = vadd.f32 %v2903_v41, %v2902_v61  ;;  %v2168_v61 = vadd.f32 1.0, %v3372_v10  ;;  %v2081_v41 = vsub.f32 0.0, %v4935_v21  ;;  %v3380_v10 = vpop.eup %3379 }
 0x3d3   :  { %v2905_v26 = vpop.f32.mrf.mxu0  ;;  %v3382_v49 = vpop.eup %3381 }
 0x3d4   :  { %v4946_v4 = vadd.f32 %v2904_v16, %v4844_v55  ;;  %v4954_v55 = vpop.permute.xlu1 %2332  ;;  %3397 = vrcp.f32 %v2168_v61  ;;  %v2128_v56 = vmul.f32 1.442695, %v2081_v41 }
 0x3d5   :  { %v2906_v17 = vpop.f32.mrf.mxu0  ;;  %3399 = vpow2.f32 %v2124_v3  ;;  %v2226_v3 = vmul.f32 %v3380_v10, %v4859_v11 }
 0x3d6   :  { %v2907_v23 = vadd.f32 %v2906_v17, %v2905_v26  ;;  %v2082_v26 = vsub.f32 0.0, %v4942_v30  ;;  %v2083_v16 = vsub.f32 0.0, %v4946_v4  ;;  %3401 = vpow2.f32 %v2126_v20 }
 0x3d7   :  { %v2908_v53 = vpop.f32.mrf.mxu0  ;;  %3403 = vpow2.f32 %v2128_v56 }
 0x3d8   :  { %v4952_v17 = vadd.f32 %v2907_v23, %v4846_v50  ;;  %v2227_v50 = vmul.f32 %v3374_v40, %v4852_v54  ;;  %v2130_v23 = vmul.f32 1.442695, %v2082_v26 }
 0x3d9   :  { %v2909_v45 = vpop.f32.mrf.mxu0 }
 0x3da   :  { %v2910_v36 = vadd.f32 %v2909_v45, %v2908_v53  ;;  %v2169_v53 = vadd.f32 1.0, %v3376_v43  ;;  %v2451_v31 = vmul.f32 %v4905_v29, %v2227_v50  ;;  %v2450_v29 = vmul.f32 %v4898_v48, %v2226_v3 }
 0x3db   :  { %v2911_v25 = vpop.f32.mrf.mxu0 }
 0x3dc   :  { %v4958_v45 = vadd.f32 %v2910_v36, %v4848_v42  ;;  %v2132_v42 = vmul.f32 1.442695, %v2083_v16  ;;  %3405 = vrcp.f32 %v2169_v53  ;;  %v4980_v53 = vpop.permute.xlu0 %2342 }
 0x3dd   :  { %v2912_v52 = vpop.f32.mrf.mxu0  ;;  %3407 = vrcp.f32 %v2170_v35 }
 0x3de   :  { %v2913_v24 = vadd.f32 %v2912_v52, %v2911_v25  ;;  %v3384_v25 = vpop.eup %3383  ;;  %v2084_v52 = vsub.f32 0.0, %v4952_v17  ;;  %v2085_v54 = vsub.f32 0.0, %v4958_v45  ;;  %3409 = vpow2.f32 %v2130_v23 }
 0x3df   :  { %v2914_v12 = vpop.f32.mrf.mxu0  ;;  %v2171_v20 = vadd.f32 1.0, %v3384_v25  ;;  %v3386_v26 = vpop.eup %3385  ;;  %3411 = vpow2.f32 %v2132_v42  ;;  %v2484_v23 = vsel %vm2482_vm0, %v2451_v31, 0.0 }
 0x3e0   :  { %v4965_v61 = vadd.f32 %v2913_v24, %v4850_v62  ;;  %v2228_v62 = vmul.f32 %v3382_v49, %v4861_v63  ;;  %v2134_v24 = vmul.f32 1.442695, %v2084_v52  ;;  %v2136_v63 = vmul.f32 1.442695, %v2085_v54 }
 0x3e1   :  { %v2915_v51 = vpop.f32.mrf.mxu0  ;;  %3413 = vrcp.f32 %v2171_v20  ;;  %v2172_v35 = vadd.f32 1.0, %v3386_v26 }
 0x3e2   :  { %v2916_v58 = vadd.f32 %v2915_v51, %v2914_v12  ;;  %v4972_v12 = vpop.permute.xlu1 %1732  ;;  %v2086_v11 = vsub.f32 0.0, %v4965_v61  ;;  %v2452_v50 = vmul.f32 %v4907_v6, %v2228_v62  ;;  %3415 = vpow2.f32 %v2134_v24 }
 0x3e3   :  { %v2917_v0 = vpop.f32.mrf.mxu0  ;;  %3417 = vpow2.f32 %v2136_v63 }
 0x3e4   :  { %v4970_v40 = vadd.f32 %v2916_v58, %v4854_v18  ;;  %v3388_v18 = vpop.eup %3387  ;;  %v2138_v52 = vmul.f32 1.442695, %v2086_v11  ;;  %v2486_v11 = vsel %vm2482_vm0, %v2452_v50, 0.0  ;;  %3419 = vrcp.f32 %v2172_v35 }
 0x3e5   :  { %v2918_v41 = vpop.f32.mrf.mxu0  ;;  %v3390_v10 = vpop.eup %3389  ;;  %v2229_v3 = vmul.f32 %v3388_v18, %v4869_v19 }
 0x3e6   :  { %v2919_v43 = vadd.f32 %v2918_v41, %v2917_v0  ;;  %v2087_v58 = vsub.f32 0.0, %v4970_v40  ;;  %v3392_v49 = vpop.eup %3391  ;;  %v2173_v54 = vadd.f32 1.0, %v3390_v10  ;;  %3421 = vpow2.f32 %v2138_v52 }
 0x3e7   :  { %v2920_v36 = vpop.f32.mrf.mxu0  ;;  %v3394_v25 = vpop.eup %3393  ;;  %v2230_v19 = vmul.f32 %v3392_v49, %v4874_v14  ;;  %v2453_v63 = vmul.f32 %v4916_v2, %v2229_v3 }
 0x3e8   :  { %v4978_v51 = vadd.f32 %v2919_v43, %v4856_v28  ;;  %v3396_v42 = vpop.eup %3395  ;;  %v4990_v43 = vpop.permute.xlu1 %1737  ;;  %v2140_v62 = vmul.f32 1.442695, %v2087_v58  ;;  %3423 = vrcp.f32 %v2173_v54 }
 0x3e9   :  { %v2921_v56 = vpop.f32.mrf.mxu0  ;;  %v2231_v50 = vmul.f32 %v3396_v42, %v4880_v1  ;;  %v2454_v54 = vmul.f32 %v4922_v57, %v2230_v19 }
 0x3ea   :  { %5152 = vst [vmem:[#allocation9_spill] sm:$0xff] %v4978_v51  ;;  %v2922_v16 = vadd.f32 %v2921_v56, %v2920_v36  ;;  %v2088_v41 = vsub.f32 0.0, %v4978_v51  ;;  %v3398_v36 = vpop.eup %3397  ;;  %v2174_v56 = vadd.f32 1.0, %v3394_v25  ;;  %v4996_v51 = vpop.permute.xlu0 %2347  ;;  %3425 = vpow2.f32 %v2140_v62 }
 0x3eb   :  { %v2923_v0 = vpop.f32.mrf.mxu0  ;;  %v3400_v26 = vpop.eup %3399  ;;  %v2490_v19 = vsel %vm2482_vm0, %v2454_v54, 0.0 }
 0x3ec   :  { %v4986_v28 = vadd.f32 %v2922_v16, %v4863_v39  ;;  %v2483_v39 = vsel %vm2482_vm0, %v2450_v29, 0.0  ;;  %v3402_v16 = vpop.eup %3401  ;;  %v2142_v18 = vmul.f32 1.442695, %v2088_v41  ;;  %v2175_v35 = vadd.f32 1.0, %v3400_v26  ;;  %v5005_v49 = vpop.permute.xlu1 %1742 }
 0x3ed   :  { %v2924_v48 = vpop.f32.mrf.mxu0  ;;  %v2485_v24 = vadd.f32 %v2484_v23, %v2483_v39  ;;  %v3404_v23 = vpop.eup %3403  ;;  %3427 = vrcp.f32 %v2174_v56  ;;  %v2176_v52 = vadd.f32 1.0, %v3402_v16 }
 0x3ee   :  { %v2089_v6 = vsub.f32 0.0, %v4986_v28  ;;  %v2925_v20 = vadd.f32 %v2924_v48, %v2923_v0  ;;  %v3406_v14 = vpop.eup %3405  ;;  %3429 = vpow2.f32 %v2142_v18  ;;  %v2177_v39 = vadd.f32 1.0, %v3404_v23 }
 0x3ef   :  { %v2926_v31 = vpop.f32.mrf.mxu0  ;;  %v3408_v41 = vpop.eup %3407  ;;  %v2487_v3 = vadd.f32 %v2486_v11, %v2485_v24  ;;  %v2233_v26 = vmul.f32 %v3406_v14, %v4891_v5 }
 0x3f0   :  { %v5000_v10 = vadd.f32 %v2925_v20, %v4866_v44  ;;  %v2144_v58 = vmul.f32 1.442695, %v2089_v6  ;;  %v2232_v44 = vmul.f32 %v3398_v36, %v4883_v32  ;;  %v3410_v6 = vpop.eup %3409  ;;  %v5013_v32 = vpop.permute.xlu0 %2352  ;;  %v2488_v36 = vsel %vm2482_vm0, %v2453_v63, 0.0 }
 0x3f1   :  { %v2927_v29 = vpop.f32.mrf.mxu0  ;;  %v2234_v11 = vmul.f32 %v3408_v41, %v4896_v22  ;;  %v2178_v18 = vadd.f32 1.0, %v3410_v6  ;;  %v2489_v5 = vadd.f32 %v2488_v36, %v2487_v3  ;;  %v2457_v23 = vmul.f32 %v4948_v33, %v2233_v26 }
 0x3f2   :  { %v2928_v0 = vadd.f32 %v2927_v29, %v2926_v31  ;;  %v2090_v25 = vsub.f32 0.0, %v5000_v10  ;;  %3431 = vpow2.f32 %v2144_v58  ;;  %v3412_v31 = vpop.eup %3411  ;;  %v2456_v24 = vmul.f32 %v4938_v15, %v2232_v44  ;;  %v5024_v58 = vpop.permute.xlu1 %2357 }
 0x3f3   :  { %v2929_v48 = vpop.f32.mrf.mxu0  ;;  %3433 = vrcp.f32 %v2175_v35  ;;  %v3414_v16 = vpop.eup %3413  ;;  %v2458_v14 = vmul.f32 %v4954_v55, %v2234_v11  ;;  %v2496_v55 = vsel %vm2482_vm0, %v2457_v23, 0.0 }
 0x3f4   :  { %v5009_v2 = vadd.f32 %v2928_v0, %v4871_v46  ;;  %v2146_v1 = vmul.f32 1.442695, %v2090_v25  ;;  %v2455_v46 = vmul.f32 %v4932_v38, %v2231_v50  ;;  %3435 = vrcp.f32 %v2176_v52  ;;  %v3416_v38 = vpop.eup %3415  ;;  %v5034_v41 = vpop.permute.xlu0 %2362 }
 0x3f5   :  { %v2930_v42 = vpop.f32.mrf.mxu0  ;;  %v2179_v0 = vadd.f32 1.0, %v3412_v31  ;;  %v3418_v25 = vpop.eup %3417  ;;  %v2235_v3 = vmul.f32 %v3414_v16, %v4903_v59  ;;  %v2180_v33 = vadd.f32 1.0, %v3416_v38 }
 0x3f6   :  { %v2091_v62 = vsub.f32 0.0, %v5009_v2  ;;  %v2931_v20 = vadd.f32 %v2930_v42, %v2929_v48  ;;  %3437 = vpow2.f32 %v2146_v1  ;;  %v2492_v22 = vsel %vm2482_vm0, %v2455_v46, 0.0  ;;  %v3420_v52 = vpop.eup %3419  ;;  %v5039_v46 = vpop.permute.xlu1 %2367 }
 0x3f7   :  { %v2932_v57 = vpop.f32.mrf.mxu0  ;;  %3439 = vrcp.f32 %v2177_v39  ;;  %v2491_v48 = vadd.f32 %v2490_v19, %v2489_v5  ;;  %v3422_v42 = vpop.eup %3421  ;;  %v2236_v26 = vmul.f32 %v3420_v52, %v4911_v9  ;;  %v2459_v16 = vmul.f32 %v4961_v47, %v2235_v3 }
 0x3f8   :  { %v2148_v56 = vmul.f32 1.442695, %v2091_v62  ;;  %v5022_v29 = vadd.f32 %v2931_v20, %v4876_v7  ;;  %v2494_v7 = vsel %vm2482_vm0, %v2456_v24, 0.0  ;;  %v3424_v20 = vpop.eup %3423  ;;  %v2182_v19 = vadd.f32 1.0, %v3422_v42 }
 0x3f9   :  { %v2933_v63 = vpop.f32.mrf.mxu0  ;;  %v2493_v6 = vadd.f32 %v2492_v22, %v2491_v48  ;;  %v3426_v36 = vpop.eup %3425  ;;  %v2237_v5 = vmul.f32 %v3424_v20, %v4914_v34  ;;  %v2460_v47 = vmul.f32 %v4980_v53, %v2236_v26  ;;  %v2500_v34 = vsel %vm2482_vm0, %v2459_v16, 0.0 }
 0x3fa   :  { %v2934_v15 = vadd.f32 %v2933_v63, %v2932_v57  ;;  %3441 = vpow2.f32 %v2148_v56  ;;  %v2092_v50 = vsub.f32 0.0, %v5022_v29  ;;  %v3428_v11 = vpop.eup %3427  ;;  %v2498_v56 = vsel %vm2482_vm0, %v2458_v14, 0.0 }
 0x3fb   :  { %v2935_v35 = vpop.f32.mrf.mxu0  ;;  %3443 = vrcp.f32 %v2178_v18  ;;  %v2495_v59 = vadd.f32 %v2494_v7, %v2493_v6  ;;  %v3430_v63 = vpop.eup %3429 }
 0x3fc   :  { %v5032_v44 = vadd.f32 %v2934_v15, %v4886_v37  ;;  %v2150_v54 = vmul.f32 1.442695, %v2092_v50  ;;  %3445 = vrcp.f32 %v2179_v0  ;;  %v2181_v37 = vadd.f32 1.0, %v3418_v25  ;;  %v5049_v15 = vpop.permute.xlu0 %2372 }
 0x3fd   :  { %v2936_v1 = vpop.f32.mrf.mxu0  ;;  %v2497_v38 = vadd.f32 %v2496_v55, %v2495_v59  ;;  %v2238_v25 = vmul.f32 %v3428_v11, %v4920_v13  ;;  %v2184_v14 = vadd.f32 1.0, %v3430_v63  ;;  %v5153_v13 = vld [vmem:[#allocation7_spill] sm:$0xff] }
 0x3fe   :  { %v2093_v39 = vsub.f32 0.0, %v5032_v44  ;;  %v2937_v62 = vadd.f32 %v2936_v1, %v2935_v35  ;;  %3447 = vpow2.f32 %v2150_v54  ;;  %v5057_v54 = vpop.permute.xlu1 %2377  ;;  %v2461_v1 = vmul.f32 %v4996_v51, %v2237_v5 }
 0x3ff   :  { %v2938_v31 = vpop.f32.mrf.mxu0  ;;  %3449 = vrcp.f32 %v2180_v33  ;;  %v3432_v9 = vpop.eup %3431  ;;  %v2499_v35 = vadd.f32 %v2498_v56, %v2497_v38 }
 0x400   :  { %v2152_v57 = vmul.f32 1.442695, %v2093_v39  ;;  %v5043_v24 = vadd.f32 %v2937_v62, %v4893_v8  ;;  %v2183_v8 = vadd.f32 1.0, %v3426_v36  ;;  %v3434_v50 = vpop.eup %3433  ;;  %v2185_v42 = vadd.f32 1.0, %v3432_v9  ;;  %v2383_v59 = vpop.permute.xlu0 %2382 }
 0x401   :  { %v2939_v18 = vpop.f32.mrf.mxu0  ;;  %v3436_v7 = vpop.eup %3435  ;;  %v2574_v39 = vrot.slane %v5153_v13, 4  ;;  %v2239_v62 = vmul.f32 %v3434_v50, %v4926_v27  ;;  %v2462_v36 = vmul.f32 %v5013_v32, %v2238_v25  ;;  %v2504_v16 = vsel %vm2482_vm0, %v2461_v1, 0.0 }
 0x402   :  { %3451 = vpow2.f32 %v2152_v57  ;;  %v2094_v0 = vsub.f32 0.0, %v5043_v24  ;;  %v2940_v22 = vadd.f32 %v2939_v18, %v2938_v31  ;;  %v2502_v31 = vsel %vm2482_vm0, %v2460_v47, 0.0 }
 0x403   :  { %3453 = vrcp.f32 %v2181_v37  ;;  %v2941_v23 = vpop.f32.mrf.mxu0  ;;  %v3438_v33 = vpop.eup %3437  ;;  %v2501_v37 = vadd.f32 %v2500_v34, %v2499_v35  ;;  %v2240_v26 = vmul.f32 %v3436_v7, %v4930_v60  ;;  %v2463_v32 = vmul.f32 %v5024_v58, %v2239_v62 }
 0x404   :  { %v2154_v48 = vmul.f32 1.442695, %v2094_v0  ;;  %3455 = vrcp.f32 %v2182_v19  ;;  %v5055_v52 = vadd.f32 %v2940_v22, %v4972_v12  ;;  %v3440_v6 = vpop.eup %3439  ;;  %v2186_v57 = vadd.f32 1.0, %v3438_v33  ;;  %v2388_v60 = vpop.permute.xlu1 %2387 }
 0x405   :  { %v2942_v3 = vpop.f32.mrf.mxu0  ;;  %v2503_v0 = vadd.f32 %v2502_v31, %v2501_v37  ;;  %v2506_v9 = vsel %vm2482_vm0, %v2462_v36, 0.0  ;;  %v2508_v7 = vsel %vm2482_vm0, %v2463_v32, 0.0 }
 0x406   :  { %3457 = vpow2.f32 %v2154_v48  ;;  %v2943_v53 = vadd.f32 %v2942_v3, %v2941_v23  ;;  %v2095_v20 = vsub.f32 0.0, %v5055_v52  ;;  %v2464_v23 = vmul.f32 %v5034_v41, %v2240_v26  ;;  %v2393_v48 = vpop.permute.xlu0 %2392 }
 0x407   :  { %3459 = vrcp.f32 %v2183_v8  ;;  %v2944_v55 = vpop.f32.mrf.mxu0  ;;  %v3442_v12 = vpop.eup %3441  ;;  %v2505_v47 = vadd.f32 %v2504_v16, %v2503_v0  ;;  %v2575_v41 = vadd.f32 %v2574_v39, %v5153_v13 }
 0x408   :  { %v5066_v51 = vadd.f32 %v2943_v53, %v4990_v43  ;;  %3461 = vrcp.f32 %v2184_v14  ;;  %v2156_v11 = vmul.f32 1.442695, %v2095_v20  ;;  %v3444_v56 = vpop.eup %3443  ;;  %v2241_v43 = vmul.f32 %v3440_v6, %v4935_v21  ;;  %v2398_v62 = vpop.permute.xlu1 %2397 }
 0x409   :  { %v2945_v27 = vpop.f32.mrf.mxu0  ;;  %3463 = vrcp.f32 %v2185_v42  ;;  %v3446_v63 = vpop.eup %3445  ;;  %v2187_v38 = vadd.f32 1.0, %v3442_v12  ;;  %v2242_v50 = vmul.f32 %v3444_v56, %v4942_v30  ;;  %v2507_v30 = vadd.f32 %v2506_v9, %v2505_v47 }
 0x40a   :  { %v2096_v19 = vsub.f32 0.0, %v5066_v51  ;;  %v2946_v18 = vadd.f32 %v2945_v27, %v2944_v55  ;;  %3465 = vpow2.f32 %v2156_v11  ;;  %v2465_v34 = vmul.f32 %v5039_v46, %v2241_v43 }
 0x40b   :  { %v3448_v5 = vpop.eup %3447  ;;  %3467 = vrcp.f32 %v2186_v57  ;;  %v2510_v1 = vsel %vm2482_vm0, %v2464_v23, 0.0  ;;  %v2466_v42 = vmul.f32 %v5049_v15, %v2242_v50  ;;  %v2509_v20 = vadd.f32 %v2508_v7, %v2507_v30  ;;  %v2403_v15 = vpop.permute.xlu0 %2402 }
 0x40c   :  { %v2158_v8 = vmul.f32 1.442695, %v2096_v19  ;;  %v5075_v22 = vadd.f32 %v2946_v18, %v5005_v49  ;;  %v2188_v35 = vadd.f32 1.0, %v3448_v5  ;;  %v3450_v58 = vpop.eup %3449  ;;  %v2243_v49 = vmul.f32 %v3446_v63, %v4946_v4  ;;  %v2408_v18 = vpop.permute.xlu1 %2407 }
 0x40d   :  { %v2244_v53 = vmul.f32 %v3450_v58, %v4952_v17  ;;  %v2512_v4 = vsel %vm2482_vm0, %v2465_v34, 0.0  ;;  %v2576_v12 = vrot.slane %v2575_v41, 2  ;;  %v2511_v37 = vadd.f32 %v2510_v1, %v2509_v20 }
 0x40e   :  { %3469 = vpow2.f32 %v2158_v8  ;;  %v2097_v21 = vsub.f32 0.0, %v5075_v22  ;;  %v2467_v55 = vmul.f32 %v5057_v54, %v2243_v49  ;;  %v2514_v17 = vsel %vm2482_vm0, %v2466_v42, 0.0 }
 0x40f   :  { %v3452_v25 = vpop.eup %3451  ;;  %3471 = vrcp.f32 %v2187_v38  ;;  %v2468_v36 = vmul.f32 %v2383_v59, %v2244_v53  ;;  %v2513_v11 = vadd.f32 %v2512_v4, %v2511_v37  ;;  %v2577_v19 = vadd.f32 %v2576_v12, %v2575_v41  ;;  %v5154_v38 = vld [vmem:[#allocation9_spill] sm:$0xff]  ;;  %v2413_v8 = vpop.permute.xlu0 %2412 }
 0x410   :  { %v3454_v14 = vpop.eup %3453  ;;  %v2189_v3 = vadd.f32 1.0, %v3452_v25  ;;  %v2160_v33 = vmul.f32 1.442695, %v2097_v21  ;;  %3473 = vrcp.f32 %v2188_v35  ;;  %v2516_v56 = vsel %vm2482_vm0, %v2467_v55, 0.0  ;;  %v2418_v34 = vpop.permute.xlu1 %2417 }
 0x411   :  { %v3456_v6 = vpop.eup %3455  ;;  %v2245_v13 = vmul.f32 %v3454_v14, %v4958_v45  ;;  %v2515_v63 = vadd.f32 %v2514_v17, %v2513_v11  ;;  %v2518_v32 = vsel %vm2482_vm0, %v2468_v36, 0.0  ;;  %v2578_v35 = vrot.slane %v2577_v19, 1 }
 0x412   :  { %3475 = vrcp.f32 %v2189_v3  ;;  %v2246_v26 = vmul.f32 %v3456_v6, %v4965_v61 }
 0x413   :  { %v3458_v46 = vpop.eup %3457  ;;  %3477 = vpow2.f32 %v2160_v33  ;;  %v2469_v54 = vmul.f32 %v2388_v60, %v2245_v13  ;;  %v2517_v0 = vadd.f32 %v2516_v56, %v2515_v63  ;;  %v2579_v33 = vadd.f32 %v2578_v35, %v2577_v19  ;;  %v2423_v42 = vpop.permute.xlu0 %2422 }
 0x414   :  { %v3460_v39 = vpop.eup %3459  ;;  %v2190_v31 = vadd.f32 1.0, %v3458_v46  ;;  %v2470_v43 = vmul.f32 %v2393_v48, %v2246_v26  ;;  %v2558_v35 = vlaneseq }
 0x415   :  { %v3462_v57 = vpop.eup %3461  ;;  %v2247_v45 = vmul.f32 %v3460_v39, %v4970_v40  ;;  %v2520_v23 = vsel %vm2482_vm0, %v2469_v54, 0.0  ;;  %v2519_v58 = vadd.f32 %v2518_v32, %v2517_v0  ;;  %v2428_v39 = vpop.permute.xlu1 %2427  ;;  %vm2582_vm2 = vcmp.eq.f32.partialorder %v2579_v33, inf }
 0x416   :  { %3479 = vrcp.f32 %v2190_v31  ;;  %v3464_v27 = vpop.eup %3463  ;;  %v2248_v59 = vmul.f32 %v3462_v57, %v5154_v38  ;;  %v2522_v21 = vsel %vm2482_vm0, %v2470_v43, 0.0  ;;  %vm2584_vm3 = vcmp.eq.f32.partialorder %v2579_v33, 0.0 }
 0x417   :  { %v3466_v16 = vpop.eup %3465  ;;  %v2471_v50 = vmul.f32 %v2398_v62, %v2247_v45  ;;  %v2249_v60 = vmul.f32 %v3464_v27, %v4986_v28  ;;  %v2521_v49 = vadd.f32 %v2520_v23, %v2519_v58  ;;  %v2433_v17 = vpop.permute.xlu0 %2432 }
 0x418   :  { %v2191_v5 = vadd.f32 1.0, %v3466_v16  ;;  %v3468_v61 = vpop.eup %3467  ;;  %v2472_v25 = vmul.f32 %v2403_v15, %v2248_v59 }
 0x419   :  { %v2250_v48 = vmul.f32 %v3468_v61, %v5000_v10  ;;  %v2524_v41 = vsel %vm2482_vm0, %v2471_v50, 0.0  ;;  %v2473_v30 = vmul.f32 %v2408_v18, %v2249_v60  ;;  %v2523_v1 = vadd.f32 %v2522_v21, %v2521_v49  ;;  %v2438_v56 = vpop.permute.xlu1 %2437 }
 0x41a   :  { %3481 = vrcp.f32 %v2191_v5  ;;  %v2526_v53 = vsel %vm2482_vm0, %v2472_v25, 0.0 }
 0x41b   :  { %v3470_v9 = vpop.eup %3469  ;;  %v2474_v6 = vmul.f32 %v2413_v8, %v2250_v48  ;;  %v2525_v20 = vadd.f32 %v2524_v41, %v2523_v1  ;;  %v2528_v4 = vsel %vm2482_vm0, %v2473_v30, 0.0  ;;  %v2443_v63 = vpop.permute.xlu0 %2442  ;;  %v2559_v48 = vshrl.u32 %v2558_v35, 7 }
 0x41c   :  { %v3472_v40 = vpop.eup %3471  ;;  %v2192_v47 = vadd.f32 1.0, %v3470_v9 }
 0x41d   :  { %v3474_v7 = vpop.eup %3473  ;;  %v2251_v28 = vmul.f32 %v3472_v40, %v5009_v2  ;;  %v2527_v2 = vadd.f32 %v2526_v53, %v2525_v20  ;;  %v2530_v12 = vsel %vm2482_vm0, %v2474_v6, 0.0  ;;  %v2448_v8 = vpop.permute.xlu1 %2447 }
 0x41e   :  { %3483 = vrcp.f32 %v2192_v47  ;;  %v2252_v62 = vmul.f32 %v3474_v7, %v5022_v29  ;;  %v2585_v47 = vand.u32 2147483648, %v2579_v33 }
 0x41f   :  { %v3476_v14 = vpop.eup %3475  ;;  %v2475_v55 = vmul.f32 %v2418_v34, %v2251_v28  ;;  %v2529_v15 = vadd.f32 %v2528_v4, %v2527_v2  ;;  %v2556_v30 = vpop.permute.xlu0 %2555  ;;  %v2590_v28 = vstv %s5124_s0 }
 0x420   :  { %v3478_v3 = vpop.eup %3477  ;;  %v2253_v13 = vmul.f32 %v3476_v14, %v5032_v44  ;;  %v2476_v37 = vmul.f32 %v2423_v42, %v2252_v62  ;;  %v2560_v14 = vsub.s32 0, %v2559_v48 }
 0x421   :  { %v2193_v10 = vadd.f32 1.0, %v3478_v3  ;;  %v2532_v29 = vsel %vm2482_vm0, %v2475_v55, 0.0  ;;  %v2531_v57 = vadd.f32 %v2530_v12, %v2529_v15 }
 0x422   :  { %v2477_v36 = vmul.f32 %v2428_v39, %v2253_v13  ;;  %v2534_v11 = vsel %vm2482_vm0, %v2476_v37, 0.0  ;;  %v2561_v1 = vrot.slane %v2556_v30, %v2560_v14 }
 0x423   :  { %v3480_v46 = vpop.eup %3479  ;;  %3485 = vrcp.f32 %v2193_v10  ;;  %v2533_v54 = vadd.f32 %v2532_v29, %v2531_v57 }
 0x424   :  { %3487 = vrsqrt.f32 %v2579_v33  ;;  %v2254_v31 = vmul.f32 %v3480_v46, %v5043_v24  ;;  %v2536_v16 = vsel %vm2482_vm0, %v2477_v36, 0.0 }
 0x425   :  { %v2535_v18 = vadd.f32 %v2534_v11, %v2533_v54 }
 0x426   :  { %v2478_v27 = vmul.f32 %v2433_v17, %v2254_v31 }
 0x427   :  { %v3482_v26 = vpop.eup %3481  ;;  %v2537_v43 = vadd.f32 %v2536_v16, %v2535_v18 }
 0x428   :  { %v2255_v44 = vmul.f32 %v3482_v26, %v5055_v52  ;;  %v2538_v32 = vsel %vm2482_vm0, %v2478_v27, 0.0 }
 0x429   :  { %v2539_v61 = vadd.f32 %v2538_v32, %v2537_v43 }
 0x42a   :  { %v2479_v19 = vmul.f32 %v2438_v56, %v2255_v44 }
 0x42b   :  { %v3484_v45 = vpop.eup %3483 }
 0x42c   :  { %v2256_v24 = vmul.f32 %v3484_v45, %v5066_v51  ;;  %v2540_v59 = vsel %vm2482_vm0, %v2479_v19, 0.0 }
 0x42d   :  { %v2541_v23 = vadd.f32 %v2540_v59, %v2539_v61 }
 0x42e   :  { %v2480_v38 = vmul.f32 %v2443_v63, %v2256_v24 }
 0x430   :  { %v3486_v5 = vpop.eup %3485  ;;  %v2542_v52 = vsel %vm2482_vm0, %v2480_v38, 0.0 }
 0x431   :  { %v3488_v0 = vpop.eup %3487  ;;  %v2257_v9 = vmul.f32 %v3486_v5, %v5075_v22  ;;  %v2543_v60 = vadd.f32 %v2542_v52, %v2541_v23 }
 0x432   :  { %v2581_v40 = vmul.f32 %v3488_v0, %v2579_v33 }
 0x433   :  { %v2481_v50 = vmul.f32 %v2448_v8, %v2257_v9 }
 0x434   :  { %v2583_v25 = vsel %vm2582_vm2, %v2579_v33, %v2581_v40 }
 0x435   :  { %v2544_v51 = vsel %vm2482_vm0, %v2481_v50, 0.0  ;;  %v2586_v34 = vsel %vm2584_vm3, %v2585_v47, %v2583_v25 }
 0x436   :  { %v2545_v58 = vadd.f32 %v2544_v51, %v2543_v60  ;;  %v2588_v41 = vmul.f32 0.03125, %v2586_v34 }
 0x438   :  { %v2546_v21 = vrot.slane %v2545_v58, 4  ;;  %v2591_v53 = vmul.f32 %v2590_v28, %v2588_v41 }
 0x43a   :  { %v2547_v7 = vadd.f32 %v2546_v21, %v2545_v58 }
 0x43c   :  { %v2548_v49 = vrot.slane %v2547_v7, 2 }
 0x43e   :  { %v2549_v22 = vadd.f32 %v2548_v49, %v2547_v7 }
 0x440   :  { %v2550_v3 = vrot.slane %v2549_v22, 1 }
 0x442   :  { %v2551_v42 = vadd.f32 %v2550_v3, %v2549_v22 }
 0x444   :  { %v2562_v6 = vadd.f32 %v2561_v1, %v2551_v42 }
 0x446   :  { %v2592_v33 = vadd.f32 %v2591_v53, %v2562_v6 }
 0x448   :  { %2594 = vst.msk [vmem:[#allocation4] sm:$0x1] %vm2593_vm4, %v2592_v33 }
 0x449   :  { %3500 = shalt.err (!%p3497_p4)
}
 0x44a   :  { %2604 = dma.vmem_to_hbm [thread:$0]  %s2602_s7, 16, %s5134_s10, [#allocation5]  }
 0x44b   :  { %3509 = dma.done.wait [#allocation5], 16  }
 0x44c   :  { %3510 = vsyncadd [#allocation5], 4294967280 }
 0x44d   :  { %2608 = vsyncpa [#allocation5], 1 }

</bundles_post_ra>
